<compile_context>
chip_gen: v7x
topology: tpu7x:2x2x1
jax: 0.10.0
libtpu: 0.0.40
codegen_flags: <defaults>
</compile_context>

<pallas_src>
import numpy as np
import jax
import jax.numpy as jnp
from jax.experimental import pallas as pl
from jax.experimental.pallas import tpu as pltpu

M_HID = 32
OSC = 16
LANES = 128
SLAB_LANES = 384          # 288 state lanes + 6 action lanes + padding
N_ACT = 6

# ----------------------------------------------------------------------------
# Lane layout of the state/output slab (paired quantities lane-adjacent).
# ----------------------------------------------------------------------------
M_S, H_S, K_S, F_S = 0, 32, 64, 96
H_DOWN, H_UP, K_DOWN, K_UP, F_UP = 128, 160, 192, 224, 256
ACT_OFF = 288             # [out_h1, out_h2, out_k1, out_k2, out_f1, out_f2]

STATE_OFF = {
    "m_s": (M_S, 32),
    "h1_s": (H_S, 16), "h2_s": (H_S + 16, 16),
    "k1_s": (K_S, 16), "k2_s": (K_S + 16, 16),
    "f1_s": (F_S, 16), "f2_s": (F_S + 16, 16),
    "h1_down": (H_DOWN, 16), "h2_down": (H_DOWN + 16, 16),
    "h1_up": (H_UP, 16), "h2_up": (H_UP + 16, 16),
    "k1_down": (K_DOWN, 16), "k2_down": (K_DOWN + 16, 16),
    "k1_up": (K_UP, 16), "k2_up": (K_UP + 16, 16),
    "f1_up": (F_UP, 16), "f2_up": (F_UP + 16, 16),
}


# ----------------------------------------------------------------------------
# Synthetic parameters in PyTorch layout (GRUCell: weight_ih (3H,in), gates r|z|n).
# ----------------------------------------------------------------------------
def init_torch_params(key):
    params = {}
    keys = iter(jax.random.split(key, 64))

    def unif(shape, bound):
        return jax.random.uniform(next(keys), shape, jnp.float32, -bound, bound)

    def gru_p(name, din, hid):
        s = hid ** -0.5
        params[name + "_wih"] = unif((3 * hid, din), s)
        params[name + "_whh"] = unif((3 * hid, hid), s)
        params[name + "_bih"] = unif((3 * hid,), s)
        params[name + "_bhh"] = unif((3 * hid,), s)

    def lin_p(name, din, dout):
        s = din ** -0.5
        params[name + "_w"] = unif((dout, din), s)
        params[name + "_b"] = unif((dout,), s)

    gru_p("m_rnn", 5 + 2 * OSC, M_HID)
    for nm in ["h_rnn1", "h_rnn2", "k_rnn1", "k_rnn2"]:
        gru_p(nm, 1 + 2 * OSC, OSC)
    for nm in ["f_rnn1", "f_rnn2"]:
        gru_p(nm, 1 + OSC, OSC)

    lin_p("m_out", M_HID, 2 * OSC)
    for nm in ["h_out1", "h_out2", "k_out1", "k_out2", "f_out1", "f_out2"]:
        lin_p(nm, OSC, 1)
    for nm in ["h_out1_down", "h_out1_up", "h_out2_down", "h_out2_up",
               "k_out1_down", "k_out1_up", "k_out2_down", "k_out2_up",
               "f_out1_up", "f_out2_up"]:
        lin_p(nm, OSC, OSC)
    return params


# ----------------------------------------------------------------------------
# Host-side packing into one (rows, 128) slab; layout maps name -> (row, nrows).
# ----------------------------------------------------------------------------
class _SlabBuilder:
    def __init__(self, lanes=LANES):
        self.lanes = lanes
        self.blocks = []
        self.layout = {}
        self.rows = 0

    def add(self, name, mat):
        mat = np.asarray(mat, np.float32)
        r, c = mat.shape
        assert c <= self.lanes, (name, c)
        rp = ((r + 7) // 8) * 8                          # 8-sublane aligned blocks
        blk = np.zeros((rp, self.lanes), np.float32)
        blk[:r, :c] = mat
        self.blocks.append(blk)
        self.layout[name] = (self.rows, r)
        self.rows += rp

    def finish(self):
        return jnp.asarray(np.concatenate(self.blocks, axis=0)), dict(self.layout)


def pack_params(p):
    P = {k: np.asarray(v, np.float32) for k, v in p.items()}
    b = _SlabBuilder()

    def scat(mat, idx):
        # mat: (rows, 48) gate cols [r|z|n] (16 each) -> (rows, 96) paired gate
        # layout [r1|r2|z1|z2|n1|n2], occupying the `idx` half of each gate.
        rows = mat.shape[0]
        out = np.zeros((rows, 6 * OSC), np.float32)
        for g in range(3):
            out[:, 2 * OSC * g + OSC * idx: 2 * OSC * g + OSC * (idx + 1)] = \
                mat[:, OSC * g: OSC * (g + 1)]
        return out

    # ---- master GRU (hidden 32, not paired; gate cols [r|z|n] 32 each) ----
    wih_t = P["m_rnn_wih"].T                             # (37, 96)
    b.add("m_sb", np.concatenate([wih_t[0:5, :],         # 5 obs rows
                                  P["m_rnn_bih"][None, :],
                                  P["m_rnn_bhh"][None, :]], axis=0))   # (7, 96)
    b.add("m_wup", wih_t[5:37, :])                       # h1_up|h2_up component
    b.add("m_whh", P["m_rnn_whh"].T)                     # (32, 96)

    # ---- paired GRUs: block-diagonal fused weights ----
    def pack_pair_gru(tag, n1, n2, ncomp):
        w1 = P[n1 + "_wih"].T                            # (din, 48)
        w2 = P[n2 + "_wih"].T
        sb = np.concatenate([
            scat(w1[0:1, :], 0),                         # scalar input row, subnet 1
            scat(w2[0:1, :], 1),                         # scalar input row, subnet 2
            scat(P[n1 + "_bih"][None, :], 0) + scat(P[n2 + "_bih"][None, :], 1),
            scat(P[n1 + "_bhh"][None, :], 0) + scat(P[n2 + "_bhh"][None, :], 1),
        ], axis=0)                                       # (4, 96)
        b.add(tag + "_sb", sb)
        for j in range(ncomp):                           # 16-wide input components
            r0 = 1 + j * OSC
            b.add(f"{tag}_w{j}",
                  np.concatenate([scat(w1[r0:r0 + OSC, :], 0),
                                  scat(w2[r0:r0 + OSC, :], 1)], axis=0))  # (32, 96)
        b.add(tag + "_whh",
              np.concatenate([scat(P[n1 + "_whh"].T, 0),
                              scat(P[n2 + "_whh"].T, 1)], axis=0))        # (32, 96)

    pack_pair_gru("h", "h_rnn1", "h_rnn2", 2)            # w0 = out_m pair, w1 = k_up pair
    pack_pair_gru("k", "k_rnn1", "k_rnn2", 2)            # w0 = h_down pair, w1 = f_up pair
    pack_pair_gru("f", "f_rnn1", "f_rnn2", 1)            # w0 = k_down pair

    # ---- output heads (last row of each block = fused bias) ----
    b.add("m_head", np.concatenate([P["m_out_w"].T, P["m_out_b"][None, :]], 0))  # (33, 32)

    def pack_hk_head(tag, c):
        W = np.zeros((32, 66), np.float32)
        bias = np.zeros((1, 66), np.float32)
        W[0:16, 0:16] = P[f"{c}_out1_down_w"].T;  bias[0, 0:16] = P[f"{c}_out1_down_b"]
        W[16:32, 16:32] = P[f"{c}_out2_down_w"].T; bias[0, 16:32] = P[f"{c}_out2_down_b"]
        W[0:16, 32:48] = P[f"{c}_out1_up_w"].T;   bias[0, 32:48] = P[f"{c}_out1_up_b"]
        W[16:32, 48:64] = P[f"{c}_out2_up_w"].T;  bias[0, 48:64] = P[f"{c}_out2_up_b"]
        W[0:16, 64:65] = P[f"{c}_out1_w"].T;      bias[0, 64] = P[f"{c}_out1_b"][0]
        W[16:32, 65:66] = P[f"{c}_out2_w"].T;     bias[0, 65] = P[f"{c}_out2_b"][0]
        b.add(tag, np.concatenate([W, bias], axis=0))    # (33, 66)

    pack_hk_head("h_head", "h")
    pack_hk_head("k_head", "k")

    W = np.zeros((32, 34), np.float32)
    bias = np.zeros((1, 34), np.float32)
    W[0:16, 0:16] = P["f_out1_up_w"].T;  bias[0, 0:16] = P["f_out1_up_b"]
    W[16:32, 16:32] = P["f_out2_up_w"].T; bias[0, 16:32] = P["f_out2_up_b"]
    W[0:16, 32:33] = P["f_out1_w"].T;    bias[0, 32] = P["f_out1_b"][0]
    W[16:32, 33:34] = P["f_out2_w"].T;   bias[0, 33] = P["f_out2_b"][0]
    b.add("f_head", np.concatenate([W, bias], axis=0))   # (33, 34)

    return b.finish()


# ----------------------------------------------------------------------------
# Pallas kernel: grid over T, state resident in VMEM scratch, weights resident.
# ----------------------------------------------------------------------------
def make_kernel(layout):
    def kernel(obs_ref, state0_ref, params_ref, out_ref, st_ref):
        t = pl.program_id(0)

        @pl.when(t == 0)
        def _():
            st_ref[...] = state0_ref[...]                # initial recurrent state

        st = st_ref[...]                                 # (1, SLAB_LANES)

        def W(name):
            off, rows = layout[name]
            return params_ref[off:off + rows, :]         # (rows, 128), zero-padded

        def S(off):
            return st[:, off:off + 32]                   # 32-lane state slice

        def sigmoid(v):                                  # exact, single EUP op
            return 0.5 * jnp.tanh(0.5 * v) + 0.5

        def dot(a, w):
            return jnp.dot(a, w, preferred_element_type=jnp.float32)

        def gru_gates(gx, gh, h):
            # gate lanes: [r(32) | z(32) | n(32)]; r and z sigmoid fused.
            rz = sigmoid(gx[:, 0:64] + gh[:, 0:64])
            r, z = rz[:, 0:32], rz[:, 32:64]
            n = jnp.tanh(gx[:, 64:96] + r * gh[:, 64:96])
            return (1.0 - z) * n + z * h

        def ob(i):                                       # scalar obs read from SMEM
            return obs_ref[t, i]

        # ---- master GRU (hidden 32) ----
        m_sb = W("m_sb")                                 # rows: 5 obs rows | bih | bhh
        gx = m_sb[5:6, :]
        for j, col in enumerate((0, 1, 8, 9, 10)):       # m_obs = x[:, [0,1,8,9,10]]
            gx = gx + ob(col) * m_sb[j:j + 1, :]
        gx = gx + dot(S(H_UP), W("m_wup"))               # [h1_up|h2_up]
        gh = dot(S(M_S), W("m_whh")) + m_sb[6:7, :]
        m_s = gru_gates(gx, gh, S(M_S))

        m_head = W("m_head")
        out_m = dot(m_s, m_head[0:32, :]) + m_head[32:33, :]   # [out_m1|out_m2]

        # ---- paired GRUs (block-diagonal): hips, knees, feet ----
        def pair_gru(tag, s1, s2, comps, h_pair):
            sb = W(tag + "_sb")                          # rows: ws1 | ws2 | bih | bhh
            gx = sb[2:3, :] + s1 * sb[0:1, :] + s2 * sb[1:2, :]
            for j, xv in enumerate(comps):
                gx = gx + dot(xv, W(f"{tag}_w{j}"))
            gh = dot(h_pair, W(tag + "_whh")) + sb[3:4, :]
            return gru_gates(gx, gh, h_pair)

        h_s = pair_gru("h", ob(2), ob(5), [out_m[:, 0:32], S(K_UP)], S(H_S))
        k_s = pair_gru("k", ob(3), ob(6), [S(H_DOWN), S(F_UP)], S(K_S))
        f_s = pair_gru("f", ob(4), ob(7), [S(K_DOWN)], S(F_S))

        # ---- fused paired output heads ----
        def head(tag, x):
            wb = W(tag)
            return dot(x, wb[0:32, :]) + wb[32:33, :]

        hh = head("h_head", h_s)   # [h_down(32) | h_up(32) | out_h1 | out_h2]
        kh = head("k_head", k_s)   # [k_down(32) | k_up(32) | out_k1 | out_k2]
        fh = head("f_head", f_s)   # [f_up(32)   | out_f1   | out_f2]

        # ---- single lane-dense slab: one register concat, one full-width store ----
        new_slab = jnp.concatenate(
            [m_s, h_s, k_s, f_s,
             hh[:, 0:64], kh[:, 0:64], fh[:, 0:32],
             hh[:, 64:66], kh[:, 64:66], fh[:, 32:34],
             jnp.zeros((1, SLAB_LANES - (ACT_OFF + N_ACT)), jnp.float32)],
            axis=1)
        st_ref[...] = new_slab
        out_ref[...] = new_slab.reshape(1, 1, SLAB_LANES)

    return kernel


def make_rnet2_rollout(layout, slab_rows):
    kernel = make_kernel(layout)

    @jax.jit
    def rollout(obs_seq, state0, params_slab):
        T = obs_seq.shape[0]
        out = pl.pallas_call(
            kernel,
            out_shape=jax.ShapeDtypeStruct((T, 1, SLAB_LANES), jnp.float32),
            grid_spec=pltpu.PrefetchScalarGridSpec(
                num_scalar_prefetch=0,
                grid=(T,),
                in_specs=[
                    # obs table in SMEM: scalars read per step, no VMEM vreg padding
                    pl.BlockSpec(memory_space=pltpu.MemorySpace.SMEM),
                    # initial state: constant index_map -> fetched once
                    pl.BlockSpec((1, SLAB_LANES), lambda t: (0, 0)),
                    # weight slab: constant index_map -> DMA'd once, resident in VMEM
                    pl.BlockSpec((slab_rows, LANES), lambda t: (0, 0)),
                ],
                out_specs=pl.BlockSpec((1, 1, SLAB_LANES), lambda t: (t, 0, 0)),
                scratch_shapes=[pltpu.VMEM((1, SLAB_LANES), jnp.float32)],
            ),
            compiler_params=pltpu.CompilerParams(
                dimension_semantics=("arbitrary",)),     # recurrent carry across t
        )(obs_seq, state0, params_slab)
        out = out[:, 0, :]                               # (T, SLAB_LANES)
        acts = out[:, ACT_OFF:ACT_OFF + N_ACT]
        # slab order [h1,h2,k1,k2,f1,f2] -> module order [h1,k1,f1,h2,k2,f2]
        actions = acts[:, jnp.array([0, 2, 4, 1, 3, 5])]
        final_state = out[-1:, :]
        return actions, final_state, out

    return rollout


# ----------------------------------------------------------------------------
# Pure-JAX reference (torch-layout weights, unpacked state dict).
# ----------------------------------------------------------------------------
def rnet2_reference(x, state, p):
    def gru(name, xin, h):
        gx = xin @ p[name + "_wih"].T + p[name + "_bih"]
        gh = h @ p[name + "_whh"].T + p[name + "_bhh"]
        H = h.shape[1]
        r = jax.nn.sigmoid(gx[:, :H] + gh[:, :H])
        z = jax.nn.sigmoid(gx[:, H:2 * H] + gh[:, H:2 * H])
        n = jnp.tanh(gx[:, 2 * H:] + r * gh[:, 2 * H:])
        return (1.0 - z) * n + z * h

    def lin(name, xin):
        return xin @ p[name + "_w"].T + p[name + "_b"][None, :]

    h1 = x[:, 2:3]; k1 = x[:, 3:4]; f1 = x[:, 4:5]
    h2 = x[:, 5:6]; k2 = x[:, 6:7]; f2 = x[:, 7:8]
    m_obs = jnp.concatenate([x[:, 0:2], x[:, 8:11]], axis=1)

    st = dict(state)
    st["m_s"] = gru("m_rnn",
                    jnp.concatenate([m_obs, st["h1_up"], st["h2_up"]], 1), st["m_s"])
    out_m = lin("m_out", st["m_s"])
    h1_s = gru("h_rnn1", jnp.concatenate([h1, out_m[:, :OSC], st["k1_up"]], 1), st["h1_s"])
    h2_s = gru("h_rnn2", jnp.concatenate([h2, out_m[:, OSC:], st["k2_up"]], 1), st["h2_s"])
    k1_s = gru("k_rnn1", jnp.concatenate([k1, st["h1_down"], st["f1_up"]], 1), st["k1_s"])
    k2_s = gru("k_rnn2", jnp.concatenate([k2, st["h2_down"], st["f2_up"]], 1), st["k2_s"])
    f1_s = gru("f_rnn1", jnp.concatenate([f1, st["k1_down"]], 1), st["f1_s"])
    f2_s = gru("f_rnn2", jnp.concatenate([f2, st["k2_down"]], 1), st["f2_s"])
    st.update(h1_s=h1_s, h2_s=h2_s, k1_s=k1_s, k2_s=k2_s, f1_s=f1_s, f2_s=f2_s)

    out_h1 = lin("h_out1", h1_s); out_h2 = lin("h_out2", h2_s)
    st["h1_down"] = lin("h_out1_down", h1_s); st["h1_up"] = lin("h_out1_up", h1_s)
    st["h2_down"] = lin("h_out2_down", h2_s); st["h2_up"] = lin("h_out2_up", h2_s)
    out_k1 = lin("k_out1", k1_s); out_k2 = lin("k_out2", k2_s)
    st["k1_down"] = lin("k_out1_down", k1_s); st["k1_up"] = lin("k_out1_up", k1_s)
    st["k2_down"] = lin("k_out2_down", k2_s); st["k2_up"] = lin("k_out2_up", k2_s)
    out_f1 = lin("f_out1", f1_s); out_f2 = lin("f_out2", f2_s)
    st["f1_up"] = lin("f_out1_up", f1_s); st["f2_up"] = lin("f_out2_up", f2_s)

    action = jnp.concatenate([out_h1, out_k1, out_f1, out_h2, out_k2, out_f2], 1)
    return action, st


# ----------------------------------------------------------------------------
if __name__ == "__main__":
    key = jax.random.PRNGKey(0)
    k_param, k_obs = jax.random.split(key, 2)

    params = init_torch_params(k_param)
    slab, layout = pack_params(params)                   # one (512, 128) weight slab
    rollout = make_rnet2_rollout(layout, slab.shape[0])

    T = 8
    obs_seq = jax.random.normal(k_obs, (T, 11), jnp.float32)
    state0 = jnp.zeros((1, SLAB_LANES), jnp.float32)     # module reset()

    actions, final_state, all_slabs = rollout(obs_seq, state0, slab)
    jax.block_until_ready((actions, final_state, all_slabs))
    assert actions.shape == (T, N_ACT)

    # pure-JAX reference, stepped serially over the same rollout
    ref_state = {nm: jnp.zeros((1, wd), jnp.float32) for nm, (o, wd) in STATE_OFF.items()}
    for t in range(T):
        ref_act, ref_state = rnet2_reference(obs_seq[t:t + 1], ref_state, params)
        assert jnp.allclose(actions[t:t + 1], ref_act, atol=2e-3, rtol=2e-3), t
        for nm, (o, wd) in STATE_OFF.items():
            assert jnp.allclose(all_slabs[t, o:o + wd], ref_state[nm][0],
                                atol=2e-3, rtol=2e-3), (t, nm)
    for nm, (o, wd) in STATE_OFF.items():
        assert jnp.allclose(final_state[0, o:o + wd], ref_state[nm][0],
                            atol=2e-3, rtol=2e-3), nm

    print("KERNEL_OK")
</pallas_src>

<mosaic_0001>
module attributes {stable_mosaic.version = 11 : i64} {
  func.func @kernel(%arg0: i32, %arg1: memref<8x11xf32, #tpu.memory_space<smem>>, %arg2: memref<1x384xf32, #tpu.memory_space<vmem>>, %arg3: memref<512x128xf32, #tpu.memory_space<vmem>>, %arg4: memref<1x1x384xf32, #tpu.memory_space<vmem>>, %arg5: memref<1x384xf32, #tpu.memory_space<vmem>>) attributes {dimension_semantics = [#tpu.dimension_semantics<arbitrary>], iteration_bounds = array<i64: 8>, scalar_prefetch = 0 : i64, scratch_operands = 1 : i64, tpu.core_type = #tpu.core_type<tc>, window_params = [{transform_indices = @transform_0, window_bounds = array<i64: 8, 11>}, {pipeline_mode = #tpu.pipeline_mode<synchronous>, transform_indices = @transform_1, window_bounds = array<i64: 1, 384>}, {pipeline_mode = #tpu.pipeline_mode<synchronous>, transform_indices = @transform_2, window_bounds = array<i64: 512, 128>}, {transform_indices = @transform_3, window_bounds = array<i64: 1, 1, 384>}]} {
    %c0_i32 = arith.constant 0 : i32
    %0 = arith.cmpi eq, %arg0, %c0_i32 : i32
    %1 = arith.extui %0 : i1 to i32
    %c0_i32_0 = arith.constant 0 : i32
    %2 = arith.cmpi ne, %1, %c0_i32_0 : i32
    scf.if %2 {
      %c0_58 = arith.constant 0 : index
      %c0_59 = arith.constant 0 : index
      %242 = vector.load %arg2[%c0_58, %c0_59] : memref<1x384xf32, #tpu.memory_space<vmem>>, vector<1x384xf32>
      %c0_60 = arith.constant 0 : index
      %c0_61 = arith.constant 0 : index
      %243 = vector.load %arg5[%c0_60, %c0_61] : memref<1x384xf32, #tpu.memory_space<vmem>>, vector<1x384xf32>
      tpu.vector_store %arg5[%c0_60, %c0_61], %242 {strides = array<i32>} : memref<1x384xf32, #tpu.memory_space<vmem>>, vector<1x384xf32>,
    } else {
    }
    %c0 = arith.constant 0 : index
    %c0_1 = arith.constant 0 : index
    %3 = vector.load %arg5[%c0, %c0_1] : memref<1x384xf32, #tpu.memory_space<vmem>>, vector<1x384xf32>
    %c0_2 = arith.constant 0 : index
    %c0_3 = arith.constant 0 : index
    %4 = vector.load %arg3[%c0_2, %c0_3] : memref<512x128xf32, #tpu.memory_space<vmem>>, vector<7x128xf32>
    %5 = vector.extract_strided_slice %4 {offsets = [5, 0], sizes = [1, 128], strides = [1, 1]} : vector<7x128xf32> to vector<1x128xf32>
    %6 = arith.index_cast %arg0 : i32 to index
    %c0_4 = arith.constant 0 : index
    %7 = memref.load %arg1[%6, %c0_4] : memref<8x11xf32, #tpu.memory_space<smem>>
    %8 = vector.extract_strided_slice %4 {offsets = [0, 0], sizes = [1, 128], strides = [1, 1]} : vector<7x128xf32> to vector<1x128xf32>
    %9 = vector.broadcast %7 : f32 to vector<1x128xf32>
    %10 = arith.mulf %9, %8 : vector<1x128xf32>
    %11 = arith.addf %5, %10 : vector<1x128xf32>
    %12 = arith.index_cast %arg0 : i32 to index
    %c1 = arith.constant 1 : index
    %13 = memref.load %arg1[%12, %c1] : memref<8x11xf32, #tpu.memory_space<smem>>
    %14 = vector.extract_strided_slice %4 {offsets = [1, 0], sizes = [1, 128], strides = [1, 1]} : vector<7x128xf32> to vector<1x128xf32>
    %15 = vector.broadcast %13 : f32 to vector<1x128xf32>
    %16 = arith.mulf %15, %14 : vector<1x128xf32>
    %17 = arith.addf %11, %16 : vector<1x128xf32>
    %18 = arith.index_cast %arg0 : i32 to index
    %c8 = arith.constant 8 : index
    %19 = memref.load %arg1[%18, %c8] : memref<8x11xf32, #tpu.memory_space<smem>>
    %20 = vector.extract_strided_slice %4 {offsets = [2, 0], sizes = [1, 128], strides = [1, 1]} : vector<7x128xf32> to vector<1x128xf32>
    %21 = vector.broadcast %19 : f32 to vector<1x128xf32>
    %22 = arith.mulf %21, %20 : vector<1x128xf32>
    %23 = arith.addf %17, %22 : vector<1x128xf32>
    %24 = arith.index_cast %arg0 : i32 to index
    %c9 = arith.constant 9 : index
    %25 = memref.load %arg1[%24, %c9] : memref<8x11xf32, #tpu.memory_space<smem>>
    %26 = vector.extract_strided_slice %4 {offsets = [3, 0], sizes = [1, 128], strides = [1, 1]} : vector<7x128xf32> to vector<1x128xf32>
    %27 = vector.broadcast %25 : f32 to vector<1x128xf32>
    %28 = arith.mulf %27, %26 : vector<1x128xf32>
    %29 = arith.addf %23, %28 : vector<1x128xf32>
    %30 = arith.index_cast %arg0 : i32 to index
    %c10 = arith.constant 10 : index
    %31 = memref.load %arg1[%30, %c10] : memref<8x11xf32, #tpu.memory_space<smem>>
    %32 = vector.extract_strided_slice %4 {offsets = [4, 0], sizes = [1, 128], strides = [1, 1]} : vector<7x128xf32> to vector<1x128xf32>
    %33 = vector.broadcast %31 : f32 to vector<1x128xf32>
    %34 = arith.mulf %33, %32 : vector<1x128xf32>
    %35 = arith.addf %29, %34 : vector<1x128xf32>
    %36 = vector.extract_strided_slice %3 {offsets = [0, 160], sizes = [1, 32], strides = [1, 1]} : vector<1x384xf32> to vector<1x32xf32>
    %c8_5 = arith.constant 8 : index
    %c0_6 = arith.constant 0 : index
    %37 = vector.load %arg3[%c8_5, %c0_6] : memref<512x128xf32, #tpu.memory_space<vmem>>, vector<32x128xf32>
    %cst = arith.constant dense<0.000000e+00> : vector<1x128xf32>
    %38 = tpu.matmul %36, %37, %cst {dimension_numbers = #tpu.dot_dimension_numbers<[1], [0], [0], [1], [0, 0, 1, 1], [], []>} : vector<1x32xf32>, vector<32x128xf32>, vector<1x128xf32> -> vector<1x128xf32>
    %39 = arith.addf %35, %38 : vector<1x128xf32>
    %40 = vector.extract_strided_slice %3 {offsets = [0, 0], sizes = [1, 32], strides = [1, 1]} : vector<1x384xf32> to vector<1x32xf32>
    %c40 = arith.constant 40 : index
    %c0_7 = arith.constant 0 : index
    %41 = vector.load %arg3[%c40, %c0_7] : memref<512x128xf32, #tpu.memory_space<vmem>>, vector<32x128xf32>
    %cst_8 = arith.constant dense<0.000000e+00> : vector<1x128xf32>
    %42 = tpu.matmul %40, %41, %cst_8 {dimension_numbers = #tpu.dot_dimension_numbers<[1], [0], [0], [1], [0, 0, 1, 1], [], []>} : vector<1x32xf32>, vector<32x128xf32>, vector<1x128xf32> -> vector<1x128xf32>
    %43 = vector.extract_strided_slice %4 {offsets = [6, 0], sizes = [1, 128], strides = [1, 1]} : vector<7x128xf32> to vector<1x128xf32>
    %44 = arith.addf %42, %43 : vector<1x128xf32>
    %45 = vector.extract_strided_slice %3 {offsets = [0, 0], sizes = [1, 32], strides = [1, 1]} : vector<1x384xf32> to vector<1x32xf32>
    %46 = vector.extract_strided_slice %39 {offsets = [0, 0], sizes = [1, 64], strides = [1, 1]} : vector<1x128xf32> to vector<1x64xf32>
    %47 = vector.extract_strided_slice %44 {offsets = [0, 0], sizes = [1, 64], strides = [1, 1]} : vector<1x128xf32> to vector<1x64xf32>
    %48 = arith.addf %46, %47 : vector<1x64xf32>
    %cst_9 = arith.constant 5.000000e-01 : f32
    %49 = vector.broadcast %cst_9 : f32 to vector<1x64xf32>
    %50 = arith.mulf %49, %48 : vector<1x64xf32>
    %51 = math.tanh %50 : vector<1x64xf32>
    %cst_10 = arith.constant 5.000000e-01 : f32
    %52 = vector.broadcast %cst_10 : f32 to vector<1x64xf32>
    %53 = arith.mulf %52, %51 : vector<1x64xf32>
    %cst_11 = arith.constant 5.000000e-01 : f32
    %54 = vector.broadcast %cst_11 : f32 to vector<1x64xf32>
    %55 = arith.addf %53, %54 : vector<1x64xf32>
    %56 = vector.extract_strided_slice %55 {offsets = [0, 0], sizes = [1, 32], strides = [1, 1]} : vector<1x64xf32> to vector<1x32xf32>
    %57 = vector.extract_strided_slice %55 {offsets = [0, 32], sizes = [1, 32], strides = [1, 1]} : vector<1x64xf32> to vector<1x32xf32>
    %58 = vector.extract_strided_slice %39 {offsets = [0, 64], sizes = [1, 32], strides = [1, 1]} : vector<1x128xf32> to vector<1x32xf32>
    %59 = vector.extract_strided_slice %44 {offsets = [0, 64], sizes = [1, 32], strides = [1, 1]} : vector<1x128xf32> to vector<1x32xf32>
    %60 = arith.mulf %56, %59 : vector<1x32xf32>
    %61 = arith.addf %58, %60 : vector<1x32xf32>
    %62 = math.tanh %61 : vector<1x32xf32>
    %cst_12 = arith.constant 1.000000e+00 : f32
    %63 = vector.broadcast %cst_12 : f32 to vector<1x32xf32>
    %64 = arith.subf %63, %57 : vector<1x32xf32>
    %65 = arith.mulf %64, %62 : vector<1x32xf32>
    %66 = arith.mulf %57, %45 : vector<1x32xf32>
    %67 = arith.addf %65, %66 : vector<1x32xf32>
    %c352 = arith.constant 352 : index
    %c0_13 = arith.constant 0 : index
    %68 = vector.load %arg3[%c352, %c0_13] : memref<512x128xf32, #tpu.memory_space<vmem>>, vector<33x128xf32>
    %69 = vector.extract_strided_slice %68 {offsets = [0, 0], sizes = [32, 128], strides = [1, 1]} : vector<33x128xf32> to vector<32x128xf32>
    %cst_14 = arith.constant dense<0.000000e+00> : vector<1x128xf32>
    %70 = tpu.matmul %67, %69, %cst_14 {dimension_numbers = #tpu.dot_dimension_numbers<[1], [0], [0], [1], [0, 0, 1, 1], [], []>} : vector<1x32xf32>, vector<32x128xf32>, vector<1x128xf32> -> vector<1x128xf32>
    %71 = vector.extract_strided_slice %68 {offsets = [32, 0], sizes = [1, 128], strides = [1, 1]} : vector<33x128xf32> to vector<1x128xf32>
    %72 = arith.addf %70, %71 : vector<1x128xf32>
    %73 = arith.index_cast %arg0 : i32 to index
    %c2 = arith.constant 2 : index
    %74 = memref.load %arg1[%73, %c2] : memref<8x11xf32, #tpu.memory_space<smem>>
    %75 = arith.index_cast %arg0 : i32 to index
    %c5 = arith.constant 5 : index
    %76 = memref.load %arg1[%75, %c5] : memref<8x11xf32, #tpu.memory_space<smem>>
    %77 = vector.extract_strided_slice %72 {offsets = [0, 0], sizes = [1, 32], strides = [1, 1]} : vector<1x128xf32> to vector<1x32xf32>
    %78 = vector.extract_strided_slice %3 {offsets = [0, 224], sizes = [1, 32], strides = [1, 1]} : vector<1x384xf32> to vector<1x32xf32>
    %79 = vector.extract_strided_slice %3 {offsets = [0, 32], sizes = [1, 32], strides = [1, 1]} : vector<1x384xf32> to vector<1x32xf32>
    %c72 = arith.constant 72 : index
    %c0_15 = arith.constant 0 : index
    %80 = vector.load %arg3[%c72, %c0_15] : memref<512x128xf32, #tpu.memory_space<vmem>>, vector<4x128xf32>
    %81 = vector.extract_strided_slice %80 {offsets = [2, 0], sizes = [1, 128], strides = [1, 1]} : vector<4x128xf32> to vector<1x128xf32>
    %82 = vector.extract_strided_slice %80 {offsets = [0, 0], sizes = [1, 128], strides = [1, 1]} : vector<4x128xf32> to vector<1x128xf32>
    %83 = vector.broadcast %74 : f32 to vector<1x128xf32>
    %84 = arith.mulf %83, %82 : vector<1x128xf32>
    %85 = arith.addf %81, %84 : vector<1x128xf32>
    %86 = vector.extract_strided_slice %80 {offsets = [1, 0], sizes = [1, 128], strides = [1, 1]} : vector<4x128xf32> to vector<1x128xf32>
    %87 = vector.broadcast %76 : f32 to vector<1x128xf32>
    %88 = arith.mulf %87, %86 : vector<1x128xf32>
    %89 = arith.addf %85, %88 : vector<1x128xf32>
    %c80 = arith.constant 80 : index
    %c0_16 = arith.constant 0 : index
    %90 = vector.load %arg3[%c80, %c0_16] : memref<512x128xf32, #tpu.memory_space<vmem>>, vector<32x128xf32>
    %cst_17 = arith.constant dense<0.000000e+00> : vector<1x128xf32>
    %91 = tpu.matmul %77, %90, %cst_17 {dimension_numbers = #tpu.dot_dimension_numbers<[1], [0], [0], [1], [0, 0, 1, 1], [], []>} : vector<1x32xf32>, vector<32x128xf32>, vector<1x128xf32> -> vector<1x128xf32>
    %92 = arith.addf %89, %91 : vector<1x128xf32>
    %c112 = arith.constant 112 : index
    %c0_18 = arith.constant 0 : index
    %93 = vector.load %arg3[%c112, %c0_18] : memref<512x128xf32, #tpu.memory_space<vmem>>, vector<32x128xf32>
    %cst_19 = arith.constant dense<0.000000e+00> : vector<1x128xf32>
    %94 = tpu.matmul %78, %93, %cst_19 {dimension_numbers = #tpu.dot_dimension_numbers<[1], [0], [0], [1], [0, 0, 1, 1], [], []>} : vector<1x32xf32>, vector<32x128xf32>, vector<1x128xf32> -> vector<1x128xf32>
    %95 = arith.addf %92, %94 : vector<1x128xf32>
    %c144 = arith.constant 144 : index
    %c0_20 = arith.constant 0 : index
    %96 = vector.load %arg3[%c144, %c0_20] : memref<512x128xf32, #tpu.memory_space<vmem>>, vector<32x128xf32>
    %cst_21 = arith.constant dense<0.000000e+00> : vector<1x128xf32>
    %97 = tpu.matmul %79, %96, %cst_21 {dimension_numbers = #tpu.dot_dimension_numbers<[1], [0], [0], [1], [0, 0, 1, 1], [], []>} : vector<1x32xf32>, vector<32x128xf32>, vector<1x128xf32> -> vector<1x128xf32>
    %98 = vector.extract_strided_slice %80 {offsets = [3, 0], sizes = [1, 128], strides = [1, 1]} : vector<4x128xf32> to vector<1x128xf32>
    %99 = arith.addf %97, %98 : vector<1x128xf32>
    %100 = vector.extract_strided_slice %95 {offsets = [0, 0], sizes = [1, 64], strides = [1, 1]} : vector<1x128xf32> to vector<1x64xf32>
    %101 = vector.extract_strided_slice %99 {offsets = [0, 0], sizes = [1, 64], strides = [1, 1]} : vector<1x128xf32> to vector<1x64xf32>
    %102 = arith.addf %100, %101 : vector<1x64xf32>
    %cst_22 = arith.constant 5.000000e-01 : f32
    %103 = vector.broadcast %cst_22 : f32 to vector<1x64xf32>
    %104 = arith.mulf %103, %102 : vector<1x64xf32>
    %105 = math.tanh %104 : vector<1x64xf32>
    %cst_23 = arith.constant 5.000000e-01 : f32
    %106 = vector.broadcast %cst_23 : f32 to vector<1x64xf32>
    %107 = arith.mulf %106, %105 : vector<1x64xf32>
    %cst_24 = arith.constant 5.000000e-01 : f32
    %108 = vector.broadcast %cst_24 : f32 to vector<1x64xf32>
    %109 = arith.addf %107, %108 : vector<1x64xf32>
    %110 = vector.extract_strided_slice %109 {offsets = [0, 0], sizes = [1, 32], strides = [1, 1]} : vector<1x64xf32> to vector<1x32xf32>
    %111 = vector.extract_strided_slice %109 {offsets = [0, 32], sizes = [1, 32], strides = [1, 1]} : vector<1x64xf32> to vector<1x32xf32>
    %112 = vector.extract_strided_slice %95 {offsets = [0, 64], sizes = [1, 32], strides = [1, 1]} : vector<1x128xf32> to vector<1x32xf32>
    %113 = vector.extract_strided_slice %99 {offsets = [0, 64], sizes = [1, 32], strides = [1, 1]} : vector<1x128xf32> to vector<1x32xf32>
    %114 = arith.mulf %110, %113 : vector<1x32xf32>
    %115 = arith.addf %112, %114 : vector<1x32xf32>
    %116 = math.tanh %115 : vector<1x32xf32>
    %cst_25 = arith.constant 1.000000e+00 : f32
    %117 = vector.broadcast %cst_25 : f32 to vector<1x32xf32>
    %118 = arith.subf %117, %111 : vector<1x32xf32>
    %119 = arith.mulf %118, %116 : vector<1x32xf32>
    %120 = arith.mulf %111, %79 : vector<1x32xf32>
    %121 = arith.addf %119, %120 : vector<1x32xf32>
    %122 = arith.index_cast %arg0 : i32 to index
    %c3 = arith.constant 3 : index
    %123 = memref.load %arg1[%122, %c3] : memref<8x11xf32, #tpu.memory_space<smem>>
    %124 = arith.index_cast %arg0 : i32 to index
    %c6 = arith.constant 6 : index
    %125 = memref.load %arg1[%124, %c6] : memref<8x11xf32, #tpu.memory_space<smem>>
    %126 = vector.extract_strided_slice %3 {offsets = [0, 128], sizes = [1, 32], strides = [1, 1]} : vector<1x384xf32> to vector<1x32xf32>
    %127 = vector.extract_strided_slice %3 {offsets = [0, 256], sizes = [1, 32], strides = [1, 1]} : vector<1x384xf32> to vector<1x32xf32>
    %128 = vector.extract_strided_slice %3 {offsets = [0, 64], sizes = [1, 32], strides = [1, 1]} : vector<1x384xf32> to vector<1x32xf32>
    %c176 = arith.constant 176 : index
    %c0_26 = arith.constant 0 : index
    %129 = vector.load %arg3[%c176, %c0_26] : memref<512x128xf32, #tpu.memory_space<vmem>>, vector<4x128xf32>
    %130 = vector.extract_strided_slice %129 {offsets = [2, 0], sizes = [1, 128], strides = [1, 1]} : vector<4x128xf32> to vector<1x128xf32>
    %131 = vector.extract_strided_slice %129 {offsets = [0, 0], sizes = [1, 128], strides = [1, 1]} : vector<4x128xf32> to vector<1x128xf32>
    %132 = vector.broadcast %123 : f32 to vector<1x128xf32>
    %133 = arith.mulf %132, %131 : vector<1x128xf32>
    %134 = arith.addf %130, %133 : vector<1x128xf32>
    %135 = vector.extract_strided_slice %129 {offsets = [1, 0], sizes = [1, 128], strides = [1, 1]} : vector<4x128xf32> to vector<1x128xf32>
    %136 = vector.broadcast %125 : f32 to vector<1x128xf32>
    %137 = arith.mulf %136, %135 : vector<1x128xf32>
    %138 = arith.addf %134, %137 : vector<1x128xf32>
    %c184 = arith.constant 184 : index
    %c0_27 = arith.constant 0 : index
    %139 = vector.load %arg3[%c184, %c0_27] : memref<512x128xf32, #tpu.memory_space<vmem>>, vector<32x128xf32>
    %cst_28 = arith.constant dense<0.000000e+00> : vector<1x128xf32>
    %140 = tpu.matmul %126, %139, %cst_28 {dimension_numbers = #tpu.dot_dimension_numbers<[1], [0], [0], [1], [0, 0, 1, 1], [], []>} : vector<1x32xf32>, vector<32x128xf32>, vector<1x128xf32> -> vector<1x128xf32>
    %141 = arith.addf %138, %140 : vector<1x128xf32>
    %c216 = arith.constant 216 : index
    %c0_29 = arith.constant 0 : index
    %142 = vector.load %arg3[%c216, %c0_29] : memref<512x128xf32, #tpu.memory_space<vmem>>, vector<32x128xf32>
    %cst_30 = arith.constant dense<0.000000e+00> : vector<1x128xf32>
    %143 = tpu.matmul %127, %142, %cst_30 {dimension_numbers = #tpu.dot_dimension_numbers<[1], [0], [0], [1], [0, 0, 1, 1], [], []>} : vector<1x32xf32>, vector<32x128xf32>, vector<1x128xf32> -> vector<1x128xf32>
    %144 = arith.addf %141, %143 : vector<1x128xf32>
    %c248 = arith.constant 248 : index
    %c0_31 = arith.constant 0 : index
    %145 = vector.load %arg3[%c248, %c0_31] : memref<512x128xf32, #tpu.memory_space<vmem>>, vector<32x128xf32>
    %cst_32 = arith.constant dense<0.000000e+00> : vector<1x128xf32>
    %146 = tpu.matmul %128, %145, %cst_32 {dimension_numbers = #tpu.dot_dimension_numbers<[1], [0], [0], [1], [0, 0, 1, 1], [], []>} : vector<1x32xf32>, vector<32x128xf32>, vector<1x128xf32> -> vector<1x128xf32>
    %147 = vector.extract_strided_slice %129 {offsets = [3, 0], sizes = [1, 128], strides = [1, 1]} : vector<4x128xf32> to vector<1x128xf32>
    %148 = arith.addf %146, %147 : vector<1x128xf32>
    %149 = vector.extract_strided_slice %144 {offsets = [0, 0], sizes = [1, 64], strides = [1, 1]} : vector<1x128xf32> to vector<1x64xf32>
    %150 = vector.extract_strided_slice %148 {offsets = [0, 0], sizes = [1, 64], strides = [1, 1]} : vector<1x128xf32> to vector<1x64xf32>
    %151 = arith.addf %149, %150 : vector<1x64xf32>
    %cst_33 = arith.constant 5.000000e-01 : f32
    %152 = vector.broadcast %cst_33 : f32 to vector<1x64xf32>
    %153 = arith.mulf %152, %151 : vector<1x64xf32>
    %154 = math.tanh %153 : vector<1x64xf32>
    %cst_34 = arith.constant 5.000000e-01 : f32
    %155 = vector.broadcast %cst_34 : f32 to vector<1x64xf32>
    %156 = arith.mulf %155, %154 : vector<1x64xf32>
    %cst_35 = arith.constant 5.000000e-01 : f32
    %157 = vector.broadcast %cst_35 : f32 to vector<1x64xf32>
    %158 = arith.addf %156, %157 : vector<1x64xf32>
    %159 = vector.extract_strided_slice %158 {offsets = [0, 0], sizes = [1, 32], strides = [1, 1]} : vector<1x64xf32> to vector<1x32xf32>
    %160 = vector.extract_strided_slice %158 {offsets = [0, 32], sizes = [1, 32], strides = [1, 1]} : vector<1x64xf32> to vector<1x32xf32>
    %161 = vector.extract_strided_slice %144 {offsets = [0, 64], sizes = [1, 32], strides = [1, 1]} : vector<1x128xf32> to vector<1x32xf32>
    %162 = vector.extract_strided_slice %148 {offsets = [0, 64], sizes = [1, 32], strides = [1, 1]} : vector<1x128xf32> to vector<1x32xf32>
    %163 = arith.mulf %159, %162 : vector<1x32xf32>
    %164 = arith.addf %161, %163 : vector<1x32xf32>
    %165 = math.tanh %164 : vector<1x32xf32>
    %cst_36 = arith.constant 1.000000e+00 : f32
    %166 = vector.broadcast %cst_36 : f32 to vector<1x32xf32>
    %167 = arith.subf %166, %160 : vector<1x32xf32>
    %168 = arith.mulf %167, %165 : vector<1x32xf32>
    %169 = arith.mulf %160, %128 : vector<1x32xf32>
    %170 = arith.addf %168, %169 : vector<1x32xf32>
    %171 = arith.index_cast %arg0 : i32 to index
    %c4 = arith.constant 4 : index
    %172 = memref.load %arg1[%171, %c4] : memref<8x11xf32, #tpu.memory_space<smem>>
    %173 = arith.index_cast %arg0 : i32 to index
    %c7 = arith.constant 7 : index
    %174 = memref.load %arg1[%173, %c7] : memref<8x11xf32, #tpu.memory_space<smem>>
    %175 = vector.extract_strided_slice %3 {offsets = [0, 192], sizes = [1, 32], strides = [1, 1]} : vector<1x384xf32> to vector<1x32xf32>
    %176 = vector.extract_strided_slice %3 {offsets = [0, 96], sizes = [1, 32], strides = [1, 1]} : vector<1x384xf32> to vector<1x32xf32>
    %c280 = arith.constant 280 : index
    %c0_37 = arith.constant 0 : index
    %177 = vector.load %arg3[%c280, %c0_37] : memref<512x128xf32, #tpu.memory_space<vmem>>, vector<4x128xf32>
    %178 = vector.extract_strided_slice %177 {offsets = [2, 0], sizes = [1, 128], strides = [1, 1]} : vector<4x128xf32> to vector<1x128xf32>
    %179 = vector.extract_strided_slice %177 {offsets = [0, 0], sizes = [1, 128], strides = [1, 1]} : vector<4x128xf32> to vector<1x128xf32>
    %180 = vector.broadcast %172 : f32 to vector<1x128xf32>
    %181 = arith.mulf %180, %179 : vector<1x128xf32>
    %182 = arith.addf %178, %181 : vector<1x128xf32>
    %183 = vector.extract_strided_slice %177 {offsets = [1, 0], sizes = [1, 128], strides = [1, 1]} : vector<4x128xf32> to vector<1x128xf32>
    %184 = vector.broadcast %174 : f32 to vector<1x128xf32>
    %185 = arith.mulf %184, %183 : vector<1x128xf32>
    %186 = arith.addf %182, %185 : vector<1x128xf32>
    %c288 = arith.constant 288 : index
    %c0_38 = arith.constant 0 : index
    %187 = vector.load %arg3[%c288, %c0_38] : memref<512x128xf32, #tpu.memory_space<vmem>>, vector<32x128xf32>
    %cst_39 = arith.constant dense<0.000000e+00> : vector<1x128xf32>
    %188 = tpu.matmul %175, %187, %cst_39 {dimension_numbers = #tpu.dot_dimension_numbers<[1], [0], [0], [1], [0, 0, 1, 1], [], []>} : vector<1x32xf32>, vector<32x128xf32>, vector<1x128xf32> -> vector<1x128xf32>
    %189 = arith.addf %186, %188 : vector<1x128xf32>
    %c320 = arith.constant 320 : index
    %c0_40 = arith.constant 0 : index
    %190 = vector.load %arg3[%c320, %c0_40] : memref<512x128xf32, #tpu.memory_space<vmem>>, vector<32x128xf32>
    %cst_41 = arith.constant dense<0.000000e+00> : vector<1x128xf32>
    %191 = tpu.matmul %176, %190, %cst_41 {dimension_numbers = #tpu.dot_dimension_numbers<[1], [0], [0], [1], [0, 0, 1, 1], [], []>} : vector<1x32xf32>, vector<32x128xf32>, vector<1x128xf32> -> vector<1x128xf32>
    %192 = vector.extract_strided_slice %177 {offsets = [3, 0], sizes = [1, 128], strides = [1, 1]} : vector<4x128xf32> to vector<1x128xf32>
    %193 = arith.addf %191, %192 : vector<1x128xf32>
    %194 = vector.extract_strided_slice %189 {offsets = [0, 0], sizes = [1, 64], strides = [1, 1]} : vector<1x128xf32> to vector<1x64xf32>
    %195 = vector.extract_strided_slice %193 {offsets = [0, 0], sizes = [1, 64], strides = [1, 1]} : vector<1x128xf32> to vector<1x64xf32>
    %196 = arith.addf %194, %195 : vector<1x64xf32>
    %cst_42 = arith.constant 5.000000e-01 : f32
    %197 = vector.broadcast %cst_42 : f32 to vector<1x64xf32>
    %198 = arith.mulf %197, %196 : vector<1x64xf32>
    %199 = math.tanh %198 : vector<1x64xf32>
    %cst_43 = arith.constant 5.000000e-01 : f32
    %200 = vector.broadcast %cst_43 : f32 to vector<1x64xf32>
    %201 = arith.mulf %200, %199 : vector<1x64xf32>
    %cst_44 = arith.constant 5.000000e-01 : f32
    %202 = vector.broadcast %cst_44 : f32 to vector<1x64xf32>
    %203 = arith.addf %201, %202 : vector<1x64xf32>
    %204 = vector.extract_strided_slice %203 {offsets = [0, 0], sizes = [1, 32], strides = [1, 1]} : vector<1x64xf32> to vector<1x32xf32>
    %205 = vector.extract_strided_slice %203 {offsets = [0, 32], sizes = [1, 32], strides = [1, 1]} : vector<1x64xf32> to vector<1x32xf32>
    %206 = vector.extract_strided_slice %189 {offsets = [0, 64], sizes = [1, 32], strides = [1, 1]} : vector<1x128xf32> to vector<1x32xf32>
    %207 = vector.extract_strided_slice %193 {offsets = [0, 64], sizes = [1, 32], strides = [1, 1]} : vector<1x128xf32> to vector<1x32xf32>
    %208 = arith.mulf %204, %207 : vector<1x32xf32>
    %209 = arith.addf %206, %208 : vector<1x32xf32>
    %210 = math.tanh %209 : vector<1x32xf32>
    %cst_45 = arith.constant 1.000000e+00 : f32
    %211 = vector.broadcast %cst_45 : f32 to vector<1x32xf32>
    %212 = arith.subf %211, %205 : vector<1x32xf32>
    %213 = arith.mulf %212, %210 : vector<1x32xf32>
    %214 = arith.mulf %205, %176 : vector<1x32xf32>
    %215 = arith.addf %213, %214 : vector<1x32xf32>
    %c392 = arith.constant 392 : index
    %c0_46 = arith.constant 0 : index
    %216 = vector.load %arg3[%c392, %c0_46] : memref<512x128xf32, #tpu.memory_space<vmem>>, vector<33x128xf32>
    %217 = vector.extract_strided_slice %216 {offsets = [0, 0], sizes = [32, 128], strides = [1, 1]} : vector<33x128xf32> to vector<32x128xf32>
    %cst_47 = arith.constant dense<0.000000e+00> : vector<1x128xf32>
    %218 = tpu.matmul %121, %217, %cst_47 {dimension_numbers = #tpu.dot_dimension_numbers<[1], [0], [0], [1], [0, 0, 1, 1], [], []>} : vector<1x32xf32>, vector<32x128xf32>, vector<1x128xf32> -> vector<1x128xf32>
    %219 = vector.extract_strided_slice %216 {offsets = [32, 0], sizes = [1, 128], strides = [1, 1]} : vector<33x128xf32> to vector<1x128xf32>
    %220 = arith.addf %218, %219 : vector<1x128xf32>
    %c432 = arith.constant 432 : index
    %c0_48 = arith.constant 0 : index
    %221 = vector.load %arg3[%c432, %c0_48] : memref<512x128xf32, #tpu.memory_space<vmem>>, vector<33x128xf32>
    %222 = vector.extract_strided_slice %221 {offsets = [0, 0], sizes = [32, 128], strides = [1, 1]} : vector<33x128xf32> to vector<32x128xf32>
    %cst_49 = arith.constant dense<0.000000e+00> : vector<1x128xf32>
    %223 = tpu.matmul %170, %222, %cst_49 {dimension_numbers = #tpu.dot_dimension_numbers<[1], [0], [0], [1], [0, 0, 1, 1], [], []>} : vector<1x32xf32>, vector<32x128xf32>, vector<1x128xf32> -> vector<1x128xf32>
    %224 = vector.extract_strided_slice %221 {offsets = [32, 0], sizes = [1, 128], strides = [1, 1]} : vector<33x128xf32> to vector<1x128xf32>
    %225 = arith.addf %223, %224 : vector<1x128xf32>
    %c472 = arith.constant 472 : index
    %c0_50 = arith.constant 0 : index
    %226 = vector.load %arg3[%c472, %c0_50] : memref<512x128xf32, #tpu.memory_space<vmem>>, vector<33x128xf32>
    %227 = vector.extract_strided_slice %226 {offsets = [0, 0], sizes = [32, 128], strides = [1, 1]} : vector<33x128xf32> to vector<32x128xf32>
    %cst_51 = arith.constant dense<0.000000e+00> : vector<1x128xf32>
    %228 = tpu.matmul %215, %227, %cst_51 {dimension_numbers = #tpu.dot_dimension_numbers<[1], [0], [0], [1], [0, 0, 1, 1], [], []>} : vector<1x32xf32>, vector<32x128xf32>, vector<1x128xf32> -> vector<1x128xf32>
    %229 = vector.extract_strided_slice %226 {offsets = [32, 0], sizes = [1, 128], strides = [1, 1]} : vector<33x128xf32> to vector<1x128xf32>
    %230 = arith.addf %228, %229 : vector<1x128xf32>
    %231 = vector.extract_strided_slice %220 {offsets = [0, 0], sizes = [1, 64], strides = [1, 1]} : vector<1x128xf32> to vector<1x64xf32>
    %232 = vector.extract_strided_slice %225 {offsets = [0, 0], sizes = [1, 64], strides = [1, 1]} : vector<1x128xf32> to vector<1x64xf32>
    %233 = vector.extract_strided_slice %230 {offsets = [0, 0], sizes = [1, 32], strides = [1, 1]} : vector<1x128xf32> to vector<1x32xf32>
    %234 = vector.extract_strided_slice %220 {offsets = [0, 64], sizes = [1, 2], strides = [1, 1]} : vector<1x128xf32> to vector<1x2xf32>
    %235 = vector.extract_strided_slice %225 {offsets = [0, 64], sizes = [1, 2], strides = [1, 1]} : vector<1x128xf32> to vector<1x2xf32>
    %236 = vector.extract_strided_slice %230 {offsets = [0, 32], sizes = [1, 2], strides = [1, 1]} : vector<1x128xf32> to vector<1x2xf32>
    %cst_52 = arith.constant 0.000000e+00 : f32
    %237 = vector.broadcast %cst_52 : f32 to vector<1x90xf32>
    %238 = tpu.concatenate %67, %121, %170, %215, %231, %232, %233, %234, %235, %236, %237 in 1 : vector<1x32xf32>, vector<1x32xf32>, vector<1x32xf32>, vector<1x32xf32>, vector<1x64xf32>, vector<1x64xf32>, vector<1x32xf32>, vector<1x2xf32>, vector<1x2xf32>, vector<1x2xf32>, vector<1x90xf32> -> vector<1x384xf32>
    %c0_53 = arith.constant 0 : index
    %c0_54 = arith.constant 0 : index
    %239 = vector.load %arg5[%c0_53, %c0_54] : memref<1x384xf32, #tpu.memory_space<vmem>>, vector<1x384xf32>
    tpu.vector_store %arg5[%c0_53, %c0_54], %238 {strides = array<i32>} : memref<1x384xf32, #tpu.memory_space<vmem>>, vector<1x384xf32>,
    %240 = vector.shape_cast %238 : vector<1x384xf32> to vector<1x1x384xf32>
    %c0_55 = arith.constant 0 : index
    %c0_56 = arith.constant 0 : index
    %c0_57 = arith.constant 0 : index
    %241 = vector.load %arg4[%c0_55, %c0_56, %c0_57] : memref<1x1x384xf32, #tpu.memory_space<vmem>>, vector<1x1x384xf32>
    tpu.vector_store %arg4[%c0_55, %c0_56, %c0_57], %240 {strides = array<i32>} : memref<1x1x384xf32, #tpu.memory_space<vmem>>, vector<1x1x384xf32>,
    return
  }
  func.func @transform_0(%arg0: i32) -> (i32, i32) {
    %c0_i32 = arith.constant 0 : i32
    %c0_i32_0 = arith.constant 0 : i32
    %c0_i32_1 = arith.constant 0 : i32
    return %c0_i32, %c0_i32_0 : i32, i32
  }
  func.func @transform_1(%arg0: i32) -> (i32, i32) {
    %c0_i32 = arith.constant 0 : i32
    %c0_i32_0 = arith.constant 0 : i32
    %c0_i32_1 = arith.constant 0 : i32
    return %c0_i32, %c0_i32_0 : i32, i32
  }
  func.func @transform_2(%arg0: i32) -> (i32, i32) {
    %c0_i32 = arith.constant 0 : i32
    %c0_i32_0 = arith.constant 0 : i32
    %c0_i32_1 = arith.constant 0 : i32
    return %c0_i32, %c0_i32_0 : i32, i32
  }
  func.func @transform_3(%arg0: i32) -> (i32, i32, i32) {
    %c0_i32 = arith.constant 0 : i32
    %c0_i32_0 = arith.constant 0 : i32
    %c0_i32_1 = arith.constant 0 : i32
    return %arg0, %c0_i32, %c0_i32_0 : i32, i32, i32
  }
}

</mosaic_0001>

<bundles_post_ra>
// kernel: rollout.1
= control target key start
LH: loop header
LB: loop body
LE: loop exit
PB: predicated region body
PF: predicated region fallthrough
CT: control target
= control target key end

     0   :  { %8 = vsyncpa [#allocation5], 0  ;;  %s2523_s0 = inlined_call_operand.hbm [shape: f32[8,11], index: 0, kind: input, shape index: {}]   ;;  %s2524_s1 = inlined_call_operand.hbm [shape: f32[1,384], index: 1, kind: input, shape index: {}]   ;;  %s2525_s2 = inlined_call_operand.hbm [shape: f32[512,128], index: 2, kind: input, shape index: {}]   ;;  %s2526_s3 = inlined_call_operand.vmem [shape: f32[8,1,384], index: 3, kind: output, shape index: {}]  }
   0x1   :  { %9 = vsyncpa [#allocation4], 0 }
   0x2   :  { %10 = vsyncpa [#allocation8], 0  ;;  %s2228_s12 = smov 0  }
   0x3 LB: > { %s2234_s13 = sadd.s32 4294967295, %s2192_s12   ;;  %p1704_p0 = scmp.ge.s32.totalorder %s2192_s12, 1  ;;  %s2192_s12 = sphi %s2228_s12, %s16_s12  }
   0x4   : > { %p110_p1 = scmp.lt.s32.totalorder %s2192_s12, 9  ;;  %p2061_p4 = scmp.eq.s32.totalorder %s2234_s13, 0 }
   0x5   : > { %s2194_s15 = smov [#allocation6]   ;;  %s2195_s17 = smov [#allocation7]  }
   0x6   : > { %p2239_p3 = pnand %p1704_p0, %p110_p1  ;;  %s132_s16 = sshll.u32 %s2194_s15, 4  ;;  %s2252_s16 = int_to_ptr.vmem [resolvable:$true] %s132_s16 }
   0x7   : > { %s142_s18 = sshll.u32 %s2195_s17, 4  ;;  %s2105_s22 = scalar_lea.hbm %s2523_s0, 128  ;;  %s2254_s18 = int_to_ptr.vmem [resolvable:$true] %s142_s18 }
   0x8   : > { %p2051_p5 = pneg %p2239_p3  ;;  %p2106_p7 = scmp.ne.s32.totalorder %s2523_s0, %s2105_s22 }
   0x9   : > { %p2112_p11 = scmp.lt.u32.totalorder %s2105_s22, %s2523_s0 }
   0xa   : > { %p2248_p6 = pnand %p2061_p4, %p2051_p5 }
   0xc   : > { %p2264_p8 = pneg %p2248_p6 }
   0xe   : > { %p2108_p9 = pnand %p2264_p8, %p2106_p7 }
  0x10   : > { %p2109_p10 = pneg %p2108_p9 }
  0x12   : > { %p2114_p12 = pnand %p2112_p11, %p2109_p10 }
  0x14   : > { %2117 = shalt.err (!%p2114_p12)
}
  0x15   : > { %s2196_s28 = smov [#allocation3]   ;;  %s2118_s6 = scalar_lea.hbm %s2524_s1, 48 }
  0x16   : > { %2054 = dma.hbm_to_smem (!%p2248_p6), %s2523_s0, 128, %s2196_s28, [#allocation5]  }
  0x17   : > { %p2119_p13 = scmp.ne.s32.totalorder %s2524_s1, %s2118_s6  ;;  %p2125_p5 = scmp.lt.u32.totalorder %s2118_s6, %s2524_s1 }
  0x19   : > { %p2121_p0 = pnand %p2119_p13, %p2264_p8 }
  0x1b   : > { %p2122_p1 = pneg %p2121_p0 }
  0x1d   : > { %p2127_p7 = pnand %p2125_p5, %p2122_p1 }
  0x1f   : > { %2130 = shalt.err (!%p2127_p7)
}
  0x20   : > { %s2131_s11 = scalar_lea.vmem %s2252_s16, 48  ;;  %s2138_s15 = scalar_lea.vmem %s2252_s16, 64 }
  0x21   : > { %p2132_p9 = scmp.ne.s32.totalorder %s2252_s16, %s2131_s11  ;;  %p2139_p12 = scmp.lt.s32.totalorder %s2252_s16, %s2252_s16 }
  0x22   : > { %p2140_p13 = scmp.lt.s32.totalorder %s2138_s15, %s2131_s11 }
  0x23   : > { %p2134_p10 = pnand %p2132_p9, %p2264_p8 }
  0x24   : > { %p2141_p0 = por %p2140_p13, %p2139_p12 }
  0x25   : > { %p2135_p11 = pneg %p2134_p10 }
  0x27   : > { %p2142_p2 = pnand %p2141_p0, %p2135_p11 }
  0x29   : > { %2145 = shalt.err (!%p2142_p2)
}
  0x2a   : > { %2057 = dma.hbm_to_vmem [thread:$0]  (!%p2248_p6), %s2524_s1, 48, %s2252_s16, [#allocation4]  }
  0x2b   : > { %s2146_s23 = scalar_lea.hbm %s2525_s2, 8192 }
  0x2c   : > { %p2147_p1 = scmp.ne.s32.totalorder %s2525_s2, %s2146_s23  ;;  %p2153_p2 = scmp.lt.u32.totalorder %s2146_s23, %s2525_s2 }
  0x2e   : > { %p2149_p5 = pnand %p2147_p1, %p2264_p8 }
  0x30   : > { %p2150_p7 = pneg %p2149_p5 }
  0x32   : > { %p2155_p9 = pnand %p2153_p2, %p2150_p7 }
  0x34   : > { %2158 = shalt.err (!%p2155_p9)
}
  0x35   : > { %s2159_s16 = scalar_lea.vmem %s2254_s18, 8192  ;;  %p2167_p13 = scmp.lt.s32.totalorder %s2254_s18, %s2254_s18 }
  0x36   : > { %p2160_p10 = scmp.ne.s32.totalorder %s2254_s18, %s2159_s16  ;;  %p2168_p0 = scmp.lt.s32.totalorder %s2159_s16, %s2159_s16 }
  0x38   : > { %p2162_p11 = pnand %p2160_p10, %p2264_p8  ;;  %p2169_p1 = por %p2168_p0, %p2167_p13 }
  0x3a   : > { %p2163_p12 = pneg %p2162_p11 }
  0x3c   : > { %p2170_p5 = pnand %p2169_p1, %p2163_p12 }
  0x3e   : > { %2173 = shalt.err (!%p2170_p5)
}
  0x3f   : > { %s2197_s29 = smov 128   ;;  %s2198_s30 = smov 8  }
  0x40   : > { %2060 = dma.hbm_to_vmem [thread:$0]  (!%p2248_p6), %s2525_s2, 8192, %s2254_s18, [#allocation8], %s2197_s29, %s2197_s29, %s2198_s30  }
  0x41   : > { %158 = sbr.rel (%p2239_p3) target bundleno = 2085 (0x825), region = 32 }
  0x48   : > { %2179 = dma.done.wait (%p2061_p4), [#allocation5], 128  }
  0x49   : > { %2181 = vsyncadd (%p2061_p4), [#allocation5], 4294967168 }
  0x4a   : > { %2183 = dma.done.wait (%p2061_p4), [#allocation4], 48  }
  0x4b   : > { %2185 = vsyncadd (%p2061_p4), [#allocation4], 4294967248 }
  0x4c   : > { %2187 = dma.done.wait (%p2061_p4), [#allocation8], 8192  }
  0x4d   : > { %2189 = vsyncadd (%p2061_p4), [#allocation8], 4294959104 }
  0x4e   : > { %172 = sfence }
  0x4f   : > { %p185_p3 = scmp.lt.s32.totalorder %s2234_s13, 7  ;;  %p2530_p6 = scmp.ne.s32.totalorder %s2234_s13, 0 }
  0x50   : > { %v193_v0 = vld [vmem:[#allocation6] sm:$0x7] (!%p2530_p6)  ;;  %v194_v1 = vlaneseq (!%p2530_p6) }
  0x51   : > { %s186_s14 = scalar_select %p185_p3, %s2234_s13, 7 }
  0x52   : > { %192 = sbr.rel (%p2530_p6) target bundleno = 89 (0x59), region = 48  ;;  %vm196_vm0 = vcmp.lt.s32.totalorder (!%p2530_p6), %v194_v1, 384 }
  0x53   : > { %s2038_s18 = smul.u32 3, %s186_s14  ;;  %198 = vst.msk [vmem:[#allocation2] sm:$0x7] (!%p2530_p6), %vm196_vm0, %v193_v0 }
  0x55   : > { %s2344_s6 = scalar_lea.vmem %s2526_s3, %s2038_s18 }
  0x59 PF: > { %v246_v2 = vlaneseq  ;;  %v329_v3 = vld [vmem:[#allocation7 + $0x28] sm:$0xff]  ;;  %v330_v4 = vld [vmem:[#allocation7 + $0x30] sm:$0xff]  ;;  %v2199_v5 = vmov 0.0|0.0   ;;  %v331_v7 = vld [vmem:[#allocation7 + $0x38] sm:$0xff]  ;;  %vm2200_vm1 = vmmov 0   ;;  %v2201_v11 = vmov 0.0  }
  0x5a   : > { %1960 = vmatprep.subr.bf16.mxu1 %v2199_v5  ;;  %v1961_v6 = vpack.c.bf16 %v330_v4, %v329_v3  ;;  %v332_v8 = vld [vmem:[#allocation7 + $0x40] sm:$0xff]  ;;  %1954 = vmatprep.subr.bf16.mxu0 %v2199_v5  ;;  %v241_v9 = vld [vmem:[#allocation7 + $0x8] sm:$0xff]  ;;  %v242_v12 = vld [vmem:[#allocation7 + $0x10] sm:$0xff]  ;;  %vm252_vm2 = vcmask 261120   ;;  %s2202_s7 = smov 96   ;;  %s2203_s8 = smov 64  }
  0x5b   : > { %v2351_v10 = vshrl.u32 %v246_v2, 7  ;;  %1819 = vmatprep.mubr.msk.f32.mxu1 %vm2200_vm1, %v2201_v11  ;;  %v243_v13 = vld [vmem:[#allocation7 + $0x18] sm:$0xff]  ;;  %v244_v14 = vld [vmem:[#allocation7 + $0x20] sm:$0xff]  ;;  %1808 = vmatprep.mubr.msk.f32.mxu0 %vm2200_vm1, %v2201_v11  ;;  %v1964_v16 = vpack.c.bf16 %v332_v8, %v331_v7  ;;  %v1955_v17 = vpack.c.bf16 %v242_v12, %v241_v9  ;;  %s2204_s9 = smov 32   ;;  %s2388_s10 = sshll.u32 %s2234_s13, 7  ;;  %v442_v0 = vld [vmem:[#allocation7 + $0x168] sm:$0xff] }
  0x5c   : > { %v2357_v15 = vld [vmem:[#allocation2] sm:$0x7]  ;;  %1962 = vmatpush3.bf16.msra.mxu1 %v1961_v6  ;;  %v1958_v19 = vpack.c.bf16 %v244_v14, %v243_v13  ;;  %v200_v22 = vld [vmem:[#allocation7] sm:$0x7f]  ;;  %s202_s11 = sld [smem:[#allocation3 + %s2388_s10]]  ;;  %s209_s15 = sadd.s32 1, %s2388_s10 }
  0x5d   : > { %v248_v18 = vsub.s32 1, %v2351_v10  ;;  %1963 = vmatprep.subr.bf16.mxu1 %v2199_v5  ;;  %1956 = vmatpush3.bf16.msra.mxu0 %v1955_v17  ;;  %v334_v23 = vrot.slane %v200_v22, 6  ;;  %v434_v27 = vsub.s32 0, %v2351_v10  ;;  %s210_s17 = sld [smem:[#allocation3 + %s209_s15]]  ;;  %s217_s20 = sadd.s32 8, %s2388_s10  ;;  %v441_v63 = vld [vmem:[#allocation7 + $0x160] sm:$0xff] }
  0x5e   : > { %1957 = vmatprep.subr.bf16.mxu0 %v2199_v5  ;;  %s218_s21 = sld [smem:[#allocation3 + %s217_s20]]  ;;  %s225_s22 = sadd.s32 9, %s2388_s10  ;;  %v443_v1 = vld [vmem:[#allocation7 + $0x170] sm:$0xff]  ;;  %v1967_v3 = vpack.c.bf16 %v442_v0, %v441_v63  ;;  %v444_v4 = vld [vmem:[#allocation7 + $0x178] sm:$0xff]  ;;  %vm1587_vm3 = vcmask 277504   ;;  %vm1589_vm4 = vcmask 293888  }
  0x5f   : > { %v2362_v20 = vrot.slane %v2357_v15, %v248_v18  ;;  %v2379_v29 = vrot.slane %v2357_v15, %v434_v27  ;;  %s226_s23 = sld [smem:[#allocation3 + %s225_s22]]  ;;  %s233_s24 = sadd.s32 10, %s2388_s10  ;;  %v1970_v6 = vpack.c.bf16 %v444_v4, %v443_v1  ;;  %v539_v18 = vld [vmem:[#allocation7 + $0x50] sm:$0xff]  ;;  %v908_v4 = vld [vmem:[#allocation7 + $0xe0] sm:$0xff]  ;;  %vm1591_vm5 = vcmask 310272  }
  0x60   : > { %1965 = vmatpush3.bf16.msra.mxu1 %v1964_v16  ;;  %s234_s13 = sld [smem:[#allocation3 + %s233_s24]]  ;;  %s810_s26 = sadd.s32 3, %s2388_s10  ;;  %vm1581_vm6 = vcmask 523264   ;;  %vm1583_vm7 = vcmask 785408   ;;  %vm1623_vm8 = vcmp.lt.s32.totalorder %v246_v2, 384 }
  0x61   : > { %250 = vrot.lane.b32.xlu0 %v2362_v20, %s2202_s7  ;;  %1972 = vmatprep.subr.bf16.mxu1 %v2199_v5  ;;  %s811_s27 = sld [smem:[#allocation3 + %s810_s26]]  ;;  %s812_s28 = sadd.s32 6, %s2388_s10 }
  0x62   : > { %1959 = vmatpush3.bf16.msra.mxu0 %v1958_v19  ;;  %v203_v30 = vstv %s202_s11  ;;  %v540_v19 = vld [vmem:[#allocation7 + $0x58] sm:$0xff]  ;;  %s813_s16 = sld [smem:[#allocation3 + %s812_s28]]  ;;  %s522_s29 = sadd.s32 2, %s2388_s10 }
  0x63   : > { %1820 = vmatmul.mubr.msk.f32.vlgmr.msra.gmra.mrb[0].mxu1 %vm252_vm2, %v2357_v15  ;;  %1966 = vmatprep.subr.bf16.mxu0 %v2199_v5  ;;  %v204_v31 = vmul.f32 %v203_v30, %v200_v22  ;;  %v211_v32 = vstv %s210_s17  ;;  %v623_v30 = vld [vmem:[#allocation7 + $0x88] sm:$0xff]  ;;  %s523_s30 = sld [smem:[#allocation3 + %s522_s29]]  ;;  %s524_s4 = sadd.s32 5, %s2388_s10 }
  0x64   : > { %1841 = vmatprep.mubr.msk.f32.mxu1 %vm2200_vm1, %v2201_v11  ;;  %v212_v34 = vmul.f32 %v211_v32, %v200_v22  ;;  %v219_v35 = vstv %s218_s21  ;;  %s525_s5 = sld [smem:[#allocation3 + %s524_s4]]  ;;  %s1099_s14 = sadd.s32 4, %s2388_s10 }
  0x65   : > { %v206_v33 = vrot.slane %v204_v31, 3  ;;  %v220_v38 = vmul.f32 %v219_v35, %v200_v22  ;;  %v227_v39 = vstv %s226_s23  ;;  %s1100_s18 = sld [smem:[#allocation3 + %s1099_s14]]  ;;  %s1101_s19 = sadd.s32 7, %s2388_s10 }
  0x66   : > { %v214_v37 = vrot.slane %v212_v34, 4  ;;  %v228_v42 = vmul.f32 %v227_v39, %v200_v22  ;;  %v235_v43 = vstv %s234_s13  ;;  %v828_v34 = vld [vmem:[#allocation7 + $0xc0] sm:$0xff]  ;;  %s1102_s25 = sld [smem:[#allocation3 + %s1101_s19]]  ;;  %s2206_s10 = smov 4  }
  0x67   : > { %v208_v36 = vadd.f32 %v206_v33, %v200_v22  ;;  %v222_v41 = vrot.slane %v220_v38, 5  ;;  %v236_v46 = vmul.f32 %v235_v43, %v200_v22  ;;  %v1973_v22 = vpack.c.bf16 %v540_v19, %v539_v18  ;;  %v827_v33 = vld [vmem:[#allocation7 + $0xb8] sm:$0xff]  ;;  %v830_v38 = vld [vmem:[#allocation7 + $0xd0] sm:$0xff]  ;;  %v993_v43 = vld [vmem:[#allocation7 + $0x108] sm:$0xff] }
  0x68   : > { %v230_v45 = vrot.slane %v228_v42, 6  ;;  %v821_v1 = vstv %s813_s16  ;;  %v913_v18 = vsub.s32 2, %v2351_v10 }
  0x69   : > { %v216_v40 = vadd.f32 %v214_v37, %v208_v36  ;;  %v238_v48 = vrot.slane %v236_v46, 7  ;;  %1974 = vmatpush3.bf16.msra.mxu1 %v1973_v22  ;;  %v1991_v36 = vpack.c.bf16 %v828_v34, %v827_v33  ;;  %v829_v37 = vld [vmem:[#allocation7 + $0xc8] sm:$0xff]  ;;  %v1198_v46 = vld [vmem:[#allocation7 + $0x140] sm:$0xff] }
  0x6a   : > { %1975 = vmatprep.subr.bf16.mxu1 %v2199_v5  ;;  %v1994_v39 = vpack.c.bf16 %v830_v38, %v829_v37 }
  0x6b   : > { %v224_v44 = vadd.f32 %v222_v41, %v216_v40  ;;  %v991_v40 = vld [vmem:[#allocation7 + $0xf8] sm:$0xff]  ;;  %v992_v41 = vld [vmem:[#allocation7 + $0x100] sm:$0xff] }
  0x6c   : > { %v2003_v42 = vpack.c.bf16 %v992_v41, %v991_v40 }
  0x6d   : > { %v232_v47 = vadd.f32 %v230_v45, %v224_v44  ;;  %v994_v44 = vld [vmem:[#allocation7 + $0x110] sm:$0xff] }
  0x6e   : > { %v2006_v45 = vpack.c.bf16 %v994_v44, %v993_v43  ;;  %v526_v43 = vld [vmem:[#allocation7 + $0x48] sm:$0xf]  ;;  %v527_v44 = vstv %s523_s30 }
  0x6f   : > { %v240_v49 = vadd.f32 %v238_v48, %v232_v47  ;;  %v1199_v47 = vld [vmem:[#allocation7 + $0x148] sm:$0xff] }
  0xd3   : > { %v251_v21 = vpop.permute.xlu0 %250 }
  0xd4   : > { %1809 = vmatmul.mubr.msk.f32.vlgmr.msra.gmra.mrb[0].mxu0 %vm252_vm2, %v251_v21  ;;  %v541_v21 = vld [vmem:[#allocation7 + $0x60] sm:$0xff] }
  0xd5   : > { %1830 = vmatprep.mubr.msk.f32.mxu0 %vm2200_vm1, %v2201_v11  ;;  %1968 = vmatpush3.bf16.msra.mxu0 %v1967_v3  ;;  %v907_v3 = vld [vmem:[#allocation7 + $0xd8] sm:$0xff] }
  0xd6   : > { %1969 = vmatprep.subr.bf16.mxu0 %v2199_v5 }
  0xd9   : > { %1971 = vmatpush3.bf16.msra.mxu0 %v1970_v6 }
  0xda   : > { %1978 = vmatprep.subr.bf16.mxu0 %v2199_v5 }
 0x136   : > { %v404_v24 = vpop.f32.mrb[0].mxu1 }
 0x137   : > { %v405_v25 = vadd.f32 %v404_v24, %v334_v23  ;;  %v1821_v26 = vpop.f32.mrb[1].mxu1  ;;  %v542_v23 = vld [vmem:[#allocation7 + $0x68] sm:$0xff] }
 0x138   : > { %v1976_v24 = vpack.c.bf16 %v542_v23, %v541_v21  ;;  %v621_v26 = vld [vmem:[#allocation7 + $0x78] sm:$0xff]  ;;  %v1116_v23 = vld [vmem:[#allocation7 + $0x120] sm:$0xff] }
 0x139   : > { %v409_v28 = vrot.slane %v405_v25, 3  ;;  %v620_v25 = vld [vmem:[#allocation7 + $0x70] sm:$0xff] }
 0x13a   : > { %1977 = vmatpush3.bf16.msra.mxu1 %v1976_v24  ;;  %v1979_v27 = vpack.c.bf16 %v621_v26, %v620_v25  ;;  %v1117_v24 = vld [vmem:[#allocation7 + $0x128] sm:$0xff]  ;;  %v914_v25 = vrot.slane %v2357_v15, %v913_v18 }
 0x13b   : > { %416 = vrot.lane.b32.xlu0 %v409_v28, %s2203_s8  ;;  %1984 = vmatprep.subr.bf16.mxu1 %v2199_v5 }
 0x13f   : > { %436 = vrot.lane.b32.xlu0 %v2379_v29, %s2204_s9 }
 0x143   : > { %624 = vrot.lane.b32.xlu0 %v2362_v20, %s2204_s9 }
 0x147   : > { %995 = vrot.lane.b32.xlu0 %v2379_v29, %s2203_s8 }
 0x1a7   : > { %v321_v50 = vpop.f32.mrb[0].mxu0 }
 0x1a8   : > { %v326_v51 = vrot.slane %v321_v50, 3  ;;  %v1810_v52 = vpop.f32.mrb[1].mxu0  ;;  %v1200_v50 = vld [vmem:[#allocation7 + $0x150] sm:$0xff] }
 0x1a9   : > { %v702_v52 = vld [vmem:[#allocation7 + $0x90] sm:$0xff] }
 0x1aa   : > { %v328_v53 = vadd.f32 %v326_v51, %v240_v49  ;;  %v2015_v49 = vpack.c.bf16 %v1199_v47, %v1198_v46  ;;  %v1201_v51 = vld [vmem:[#allocation7 + $0x158] sm:$0xff]  ;;  %v533_v46 = vstv %s525_s5 }
 0x1ac   : > { %v411_v54 = vadd.f32 %v409_v28, %v328_v53  ;;  %v622_v28 = vld [vmem:[#allocation7 + $0x80] sm:$0xff] }
 0x1ad   : > { %v417_v59 = vpop.permute.xlu0 %416  ;;  %v1982_v32 = vpack.c.bf16 %v623_v30, %v622_v28  ;;  %v1118_v30 = vld [vmem:[#allocation7 + $0x130] sm:$0xff] }
 0x1ae   : > { %v412_v55 = vmul.f32 0.5, %v411_v54  ;;  %v445_v54 = vld [vmem:[#allocation7 + $0x180] sm:$0x1] }
 0x1b0   : > { %2089 = vtanh.f32 %v412_v55 }
 0x1b1   : > { %v2399_v8 = vpop.permute.xlu0 %436 }
 0x1b5   : > { %v625_v35 = vpop.permute.xlu0 %624 }
 0x1b9   : > { %v2427_v48 = vpop.permute.xlu0 %995 }
 0x1ba   : > { %v2090_v56 = vpop.eup %2089 }
 0x1bb   : > { %v414_v57 = vmul.f32 0.5, %v2090_v56 }
 0x1bd   : > { %v415_v58 = vadd.f32 0.5, %v414_v57  ;;  %v815_v57 = vstv %s811_s27 }
 0x1bf   : > { %v419_v60 = vmul.f32 %v417_v59, %v415_v58  ;;  %v426_v9 = vsub.f32 1.0, %v415_v58  ;;  %v439_v13 = vmul.f32 %v2399_v8, %v415_v58 }
 0x1c1   : > { %421 = vrot.lane.b32.xlu1 %v419_v60, %s2203_s8  ;;  %v704_v60 = vld [vmem:[#allocation7 + $0xa0] sm:$0xff] }
 0x233   : > { %v422_v61 = vpop.permute.xlu1 %421 }
 0x234   : > { %v424_v62 = vadd.f32 %v422_v61, %v328_v53  ;;  %v703_v53 = vld [vmem:[#allocation7 + $0x98] sm:$0xff]  ;;  %v705_v61 = vld [vmem:[#allocation7 + $0xa8] sm:$0xff] }
 0x235   : > { %v1985_v56 = vpack.c.bf16 %v703_v53, %v702_v52  ;;  %v1988_v0 = vpack.c.bf16 %v705_v61, %v704_v60 }
 0x236   : > { %2091 = vtanh.f32 %v424_v62  ;;  %v814_v62 = vld [vmem:[#allocation7 + $0xb0] sm:$0xf] }
 0x237   : > { %v816_v63 = vmul.f32 %v815_v57, %v814_v62  ;;  %v998_v15 = vrot.slane %v814_v62, 3  ;;  %v1103_v57 = vld [vmem:[#allocation7 + $0x118] sm:$0xf] }
 0x238   : > { %v1203_v60 = vrot.slane %v1103_v57, 3 }
 0x239   : > { %v818_v6 = vrot.slane %v816_v63, 6 }
 0x23b   : > { %v820_v19 = vadd.f32 %v818_v6, %v814_v62 }
 0x240   : > { %v2092_v7 = vpop.eup %2091 }
 0x241   : > { %428 = vrot.lane.b32.xlu1 %v2092_v7, %s2202_s7  ;;  %v822_v7 = vmul.f32 %v821_v1, %v814_v62 }
 0x243   : > { %v824_v21 = vrot.slane %v822_v7, 7 }
 0x245   : > { %v826_v26 = vadd.f32 %v824_v21, %v820_v19 }
 0x2b3   : > { %v429_v12 = vpop.permute.xlu1 %428 }
 0x2b4   : > { %v431_v14 = vmul.f32 %v429_v12, %v426_v9  ;;  %v1997_v9 = vpack.c.bf16 %v908_v4, %v907_v3 }
 0x2b6   : > { %v2402_v16 = vadd.f32 %v439_v13, %v431_v14  ;;  %v909_v13 = vld [vmem:[#allocation7 + $0xe8] sm:$0xff]  ;;  %v910_v14 = vld [vmem:[#allocation7 + $0xf0] sm:$0xff] }
 0x2b7   : > { %v2000_v22 = vpack.c.bf16 %v910_v14, %v909_v13 }
 0x2b8   : > { %v447_v17 = vrot.slane %v2402_v16, 5 }
 0x2ba   : > { %448 = vrot.lane.b32.xlu1 %v447_v17, %s2202_s7 }
 0x2be   : > { %706 = vrot.lane.b32.xlu1 %v2379_v29, %s2202_s7 }
 0x2c2   : > { %1120 = vrot.lane.b32.xlu1 %v2362_v20, %s2203_s8 }
 0x32c   : > { %v449_v31 = vpop.permute.xlu1 %448 }
 0x32d   : > { %1831 = vmatmul.mubr.msk.f32.vlgmr.msra.gmra.mrb[2].mxu0 %vm252_vm2, %v449_v31  ;;  %v1119_v31 = vld [vmem:[#allocation7 + $0x138] sm:$0xff] }
 0x32e   : > { %1980 = vmatpush3.bf16.msra.mxu0 %v1979_v27  ;;  %1852 = vmatprep.mubr.msk.f32.mxu0 %vm2200_vm1, %v2201_v11  ;;  %v2009_v27 = vpack.c.bf16 %v1117_v24, %v1116_v23  ;;  %v1104_v24 = vstv %s1100_s18 }
 0x32f   : > { %1981 = vmatprep.subr.bf16.mxu0 %v2199_v5 }
 0x332   : > { %1983 = vmatpush3.bf16.msra.mxu0 %v1982_v32 }
 0x333   : > { %1990 = vmatprep.subr.bf16.mxu0 %v2199_v5 }
 0x335   : > { %1853 = vmatmul.mubr.msk.f32.vlgmr.msra.gmra.mrb[4].mxu0 %vm252_vm2, %v625_v35  ;;  %v2012_v35 = vpack.c.bf16 %v1119_v31, %v1118_v30 }
 0x336   : > { %1992 = vmatpush3.bf16.msra.mxu0 %v1991_v36  ;;  %1874 = vmatprep.mubr.msk.f32.mxu0 %vm2200_vm1, %v2201_v11 }
 0x337   : > { %1993 = vmatprep.subr.bf16.mxu0 %v2199_v5 }
 0x33a   : > { %1995 = vmatpush3.bf16.msra.mxu0 %v1994_v39 }
 0x33b   : > { %2002 = vmatprep.subr.bf16.mxu0 %v2199_v5 }
 0x33d   : > { %1875 = vmatmul.mubr.msk.f32.vlgmr.msra.gmra.mrb[6].mxu0 %vm252_vm2, %v2362_v20  ;;  %v2018_v20 = vpack.c.bf16 %v1201_v51, %v1200_v50 }
 0x33e   : > { %2004 = vmatpush3.bf16.msra.mxu0 %v2003_v42  ;;  %1896 = vmatprep.mubr.msk.f32.mxu0 %vm2200_vm1, %v2201_v11 }
 0x33f   : > { %2005 = vmatprep.subr.bf16.mxu0 %v2199_v5 }
 0x342   : > { %2007 = vmatpush3.bf16.msra.mxu0 %v2006_v45  ;;  %v528_v45 = vmul.f32 %v527_v44, %v526_v43 }
 0x343   : > { %2014 = vmatprep.subr.bf16.mxu0 %v2199_v5 }
 0x344   : > { %v530_v47 = vrot.slane %v528_v45, 6 }
 0x345   : > { %1897 = vmatmul.mubr.msk.f32.vlgmr.msra.gmra.mrb[8].mxu0 %vm252_vm2, %v2427_v48 }
 0x346   : > { %2016 = vmatpush3.bf16.msra.mxu0 %v2015_v49  ;;  %1918 = vmatprep.mubr.msk.f32.mxu0 %vm2200_vm1, %v2201_v11  ;;  %v534_v49 = vmul.f32 %v533_v46, %v526_v43  ;;  %v532_v50 = vadd.f32 %v530_v47, %v526_v43 }
 0x347   : > { %2017 = vmatprep.subr.bf16.mxu0 %v2199_v5 }
 0x348   : > { %v536_v51 = vrot.slane %v534_v49, 7 }
 0x34a   : > { %2019 = vmatpush3.bf16.msra.mxu0 %v2018_v20  ;;  %v538_v20 = vadd.f32 %v536_v51, %v532_v50 }
 0x34b   : > { %2026 = vmatprep.subr.bf16.mxu0 %v2199_v5 }
 0x34d   : > { %1919 = vmatmul.mubr.msk.f32.vlgmr.msra.gmra.mrb[10].mxu0 %vm252_vm2, %v2399_v8  ;;  %v2446_v8 = vpop.permute.xlu1 %706 }
 0x34e   : > { %1940 = vmatprep.mubr.msk.f32.mxu0 %vm2200_vm1, %v2201_v11 }
 0x351   : > { %v1121_v36 = vpop.permute.xlu1 %1120 }
 0x400   : > { %v518_v55 = vpop.f32.mrb[2].mxu0 }
 0x401   : > { %v519_v58 = vadd.f32 %v518_v55, %v445_v54  ;;  %v1832_v59 = vpop.f32.mrb[3].mxu0 }
 0x402   : > { %v709_v59 = vrot.slane %v526_v43, 3 }
 0x403   : > { %1842 = vmatmul.mubr.msk.f32.vlgmr.msra.gmra.mrb[2].mxu1 %vm252_vm2, %v519_v58 }
 0x404   : > { %1986 = vmatpush3.bf16.msra.mxu1 %v1985_v56  ;;  %1863 = vmatprep.mubr.msk.f32.mxu1 %vm2200_vm1, %v2201_v11 }
 0x405   : > { %1987 = vmatprep.subr.bf16.mxu1 %v2199_v5 }
 0x408   : > { %1989 = vmatpush3.bf16.msra.mxu1 %v1988_v0  ;;  %v2448_v12 = vpop.f32.mrb[4].mxu0 }
 0x409   : > { %1996 = vmatprep.subr.bf16.mxu1 %v2199_v5  ;;  %v1854_v17 = vpop.f32.mrb[5].mxu0  ;;  %v699_v55 = vrot.slane %v2448_v12, 6 }
 0x40b   : > { %1864 = vmatmul.mubr.msk.f32.vlgmr.msra.gmra.mrb[4].mxu1 %vm252_vm2, %v2446_v8 }
 0x40c   : > { %1998 = vmatpush3.bf16.msra.mxu1 %v1997_v9  ;;  %1885 = vmatprep.mubr.msk.f32.mxu1 %vm2200_vm1, %v2201_v11 }
 0x40d   : > { %1999 = vmatprep.subr.bf16.mxu1 %v2199_v5 }
 0x410   : > { %2001 = vmatpush3.bf16.msra.mxu1 %v2000_v22  ;;  %v899_v28 = vpop.f32.mrb[6].mxu0 }
 0x411   : > { %2008 = vmatprep.subr.bf16.mxu1 %v2199_v5  ;;  %v904_v32 = vrot.slane %v899_v28, 6  ;;  %v1876_v33 = vpop.f32.mrb[7].mxu0 }
 0x413   : > { %1886 = vmatmul.mubr.msk.f32.vlgmr.msra.gmra.mrb[6].mxu1 %vm252_vm2, %v914_v25  ;;  %v906_v34 = vadd.f32 %v904_v32, %v826_v26  ;;  %v1105_v25 = vmul.f32 %v1104_v24, %v1103_v57  ;;  %v1110_v26 = vstv %s1102_s25 }
 0x414   : > { %2010 = vmatpush3.bf16.msra.mxu1 %v2009_v27  ;;  %1907 = vmatprep.mubr.msk.f32.mxu1 %vm2200_vm1, %v2201_v11  ;;  %v1111_v28 = vmul.f32 %v1110_v26, %v1103_v57 }
 0x415   : > { %2011 = vmatprep.subr.bf16.mxu1 %v2199_v5  ;;  %v1107_v27 = vrot.slane %v1105_v25, 6 }
 0x416   : > { %v1113_v31 = vrot.slane %v1111_v28, 7 }
 0x417   : > { %v1109_v30 = vadd.f32 %v1107_v27, %v1103_v57  ;;  %v1385_v57 = vld [vmem:[#allocation7 + $0x1b0] sm:$0xff] }
 0x418   : > { %2013 = vmatpush3.bf16.msra.mxu1 %v2012_v35  ;;  %v1068_v37 = vpop.f32.mrb[8].mxu0 }
 0x419   : > { %v1069_v38 = vadd.f32 %v1068_v37, %v998_v15  ;;  %v1898_v39 = vpop.f32.mrb[9].mxu0  ;;  %2020 = vmatprep.subr.bf16.mxu1 %v2199_v5  ;;  %v1115_v32 = vadd.f32 %v1113_v31, %v1109_v30 }
 0x41b   : > { %1908 = vmatmul.mubr.msk.f32.vlgmr.msra.gmra.mrb[8].mxu1 %vm252_vm2, %v1121_v36  ;;  %v1073_v40 = vrot.slane %v1069_v38, 6 }
 0x41c   : > { %1929 = vmatprep.mubr.msk.f32.mxu1 %vm2200_vm1, %v2201_v11 }
 0x41d   : > { %1080 = vrot.lane.b32.xlu1 %v1073_v40, %s2203_s8 }
 0x420   : > { %v1273_v41 = vpop.f32.mrb[10].mxu0 }
 0x421   : > { %v1920_v42 = vpop.f32.mrb[11].mxu0  ;;  %v1274_v0 = vadd.f32 %v1273_v41, %v1203_v60  ;;  %v1387_v60 = vld [vmem:[#allocation7 + $0x1c0] sm:$0xff] }
 0x423   : > { %v1278_v3 = vrot.slane %v1274_v0, 6  ;;  %v1305_v0 = vld [vmem:[#allocation7 + $0x190] sm:$0xff] }
 0x48f   : > { %v1081_v21 = vpop.permute.xlu1 %1080 }
 0x4d6   : > { %v612_v52 = vpop.f32.mrb[2].mxu1 }
 0x4d7   : > { %v617_v53 = vrot.slane %v612_v52, 6  ;;  %v1843_v54 = vpop.f32.mrb[3].mxu1 }
 0x4d9   : > { %v619_v56 = vadd.f32 %v617_v53, %v538_v20 }
 0x4db   : > { %v2471_v58 = vadd.f32 %v699_v55, %v619_v56 }
 0x4de   : > { %v779_v61 = vpop.f32.mrb[4].mxu1 }
 0x4df   : > { %v780_v62 = vadd.f32 %v779_v61, %v709_v59  ;;  %v1865_v63 = vpop.f32.mrb[5].mxu1  ;;  %v1386_v59 = vld [vmem:[#allocation7 + $0x1b8] sm:$0xff] }
 0x4e0   : > { %v2027_v61 = vpack.c.bf16 %v1386_v59, %v1385_v57 }
 0x4e1   : > { %v784_v1 = vrot.slane %v780_v62, 6  ;;  %v1388_v62 = vld [vmem:[#allocation7 + $0x1c8] sm:$0xff] }
 0x4e2   : > { %2028 = vmatpush3.bf16.msra.mxu0 %v2027_v61  ;;  %v2030_v63 = vpack.c.bf16 %v1388_v62, %v1387_v60 }
 0x4e3   : > { %791 = vrot.lane.b32.xlu0 %v784_v1, %s2203_s8  ;;  %2029 = vmatprep.subr.bf16.mxu0 %v2199_v5 }
 0x4e6   : > { %v983_v4 = vpop.f32.mrb[6].mxu1  ;;  %2031 = vmatpush3.bf16.msra.mxu0 %v2030_v63 }
 0x4e7   : > { %v988_v6 = vrot.slane %v983_v4, 6  ;;  %1285 = vrot.lane.b32.xlu0 %v1278_v3, %s2203_s8  ;;  %v1887_v7 = vpop.f32.mrb[7].mxu1  ;;  %v1307_v4 = vld [vmem:[#allocation7 + $0x1a0] sm:$0xff] }
 0x4e9   : > { %v990_v9 = vadd.f32 %v988_v6, %v906_v34  ;;  %v786_v34 = vadd.f32 %v784_v1, %v2471_v58  ;;  %v1306_v1 = vld [vmem:[#allocation7 + $0x198] sm:$0xff] }
 0x4ea   : > { %v2024_v6 = vpack.c.bf16 %v1307_v4, %v1306_v1 }
 0x4eb   : > { %v1075_v12 = vadd.f32 %v1073_v40, %v990_v9  ;;  %v787_v15 = vmul.f32 0.5, %v786_v34 }
 0x4ed   : > { %v1076_v13 = vmul.f32 0.5, %v1075_v12 }
 0x4ee   : > { %v1190_v14 = vpop.f32.mrb[8].mxu1 }
 0x4ef   : > { %2093 = vtanh.f32 %v1076_v13  ;;  %v1909_v17 = vpop.f32.mrb[9].mxu1  ;;  %v1195_v33 = vrot.slane %v1190_v14, 6 }
 0x4f0   : > { %2095 = vtanh.f32 %v787_v15  ;;  %v1469_v15 = vld [vmem:[#allocation7 + $0x1f0] sm:$0xff] }
 0x4f1   : > { %v1197_v35 = vadd.f32 %v1195_v33, %v1115_v32  ;;  %v1467_v33 = vld [vmem:[#allocation7 + $0x1e0] sm:$0xff] }
 0x4f3   : > { %v1280_v36 = vadd.f32 %v1278_v3, %v1197_v35 }
 0x4f5   : > { %v1281_v37 = vmul.f32 0.5, %v1280_v36 }
 0x4f7   : > { %2097 = vtanh.f32 %v1281_v37 }
 0x4f9   : > { %v2094_v18 = vpop.eup %2093 }
 0x4fa   : > { %v1078_v19 = vmul.f32 0.5, %v2094_v18  ;;  %v2096_v38 = vpop.eup %2095 }
 0x4fb   : > { %v789_v39 = vmul.f32 0.5, %v2096_v38  ;;  %v1389_v38 = vld [vmem:[#allocation7 + $0x1d0] sm:$0x1] }
 0x4fc   : > { %v2475_v22 = vadd.f32 0.5, %v1078_v19 }
 0x4fd   : > { %v790_v41 = vadd.f32 0.5, %v789_v39 }
 0x4fe   : > { %v1083_v23 = vmul.f32 %v1081_v21, %v2475_v22  ;;  %v1090_v7 = vsub.f32 1.0, %v2475_v22  ;;  %v1097_v12 = vmul.f32 %v2475_v22, %v2446_v8 }
 0x4ff   : > { %v801_v18 = vsub.f32 1.0, %v790_v41  ;;  %v808_v21 = vmul.f32 %v790_v41, %v2379_v29 }
 0x500   : > { %1085 = vrot.lane.b32.xlu0 %v1083_v23, %s2203_s8 }
 0x501   : > { %v2098_v40 = vpop.eup %2097 }
 0x502   : > { %v1283_v42 = vmul.f32 0.5, %v2098_v40 }
 0x504   : > { %v1284_v45 = vadd.f32 0.5, %v1283_v42 }
 0x506   : > { %v1295_v25 = vsub.f32 1.0, %v1284_v45  ;;  %v1302_v27 = vmul.f32 %v1284_v45, %v2427_v48  ;;  %v1466_v48 = vld [vmem:[#allocation7 + $0x1d8] sm:$0xff] }
 0x507   : > { %v2033_v34 = vpack.c.bf16 %v1467_v33, %v1466_v48 }
 0x555   : > { %v792_v43 = vpop.permute.xlu0 %791 }
 0x556   : > { %v794_v44 = vmul.f32 %v792_v43, %v790_v41  ;;  %v1308_v43 = vld [vmem:[#allocation7 + $0x1a8] sm:$0x1] }
 0x558   : > { %796 = vrot.lane.b32.xlu1 %v794_v44, %s2203_s8 }
 0x559   : > { %v1286_v46 = vpop.permute.xlu0 %1285 }
 0x55a   : > { %v1288_v47 = vmul.f32 %v1286_v46, %v1284_v45 }
 0x55c   : > { %1290 = vrot.lane.b32.xlu1 %v1288_v47, %s2203_s8 }
 0x572   : > { %v1086_v49 = vpop.permute.xlu0 %1085 }
 0x573   : > { %v1088_v50 = vadd.f32 %v1086_v49, %v990_v9 }
 0x575   : > { %2099 = vtanh.f32 %v1088_v50 }
 0x57f   : > { %v2100_v51 = vpop.eup %2099 }
 0x580   : > { %1092 = vrot.lane.b32.xlu1 %v2100_v51, %s2202_s7 }
 0x5ca   : > { %v797_v20 = vpop.permute.xlu1 %796 }
 0x5cb   : > { %v799_v52 = vadd.f32 %v797_v20, %v2471_v58  ;;  %v1304_v58 = vld [vmem:[#allocation7 + $0x188] sm:$0xff] }
 0x5cc   : > { %v2021_v3 = vpack.c.bf16 %v1305_v0, %v1304_v58 }
 0x5cd   : > { %2101 = vtanh.f32 %v799_v52 }
 0x5ce   : > { %v1291_v53 = vpop.permute.xlu1 %1290  ;;  %2022 = vmatpush3.bf16.msra.mxu1 %v2021_v3 }
 0x5cf   : > { %v1293_v54 = vadd.f32 %v1291_v53, %v1197_v35  ;;  %2023 = vmatprep.subr.bf16.mxu1 %v2199_v5  ;;  %v1468_v35 = vld [vmem:[#allocation7 + $0x1e8] sm:$0xff] }
 0x5d0   : > { %v2036_v37 = vpack.c.bf16 %v1469_v15, %v1468_v35 }
 0x5d1   : > { %2103 = vtanh.f32 %v1293_v54 }
 0x5d2   : > { %2025 = vmatpush3.bf16.msra.mxu1 %v2024_v6 }
 0x5d3   : > { %2032 = vmatprep.subr.bf16.mxu1 %v2199_v5 }
 0x5d7   : > { %v2102_v55 = vpop.eup %2101 }
 0x5d8   : > { %803 = vrot.lane.b32.xlu0 %v2102_v55, %s2202_s7  ;;  %v2207_v55 = vmov 1966171168  }
 0x5db   : > { %v2104_v56 = vpop.eup %2103 }
 0x5dc   : > { %1297 = vrot.lane.b32.xlu0 %v2104_v56, %s2202_s7  ;;  %v1599_v56 = vunpack.c.l.s4 %v2207_v55 }
 0x5de   : > { %v1600_v60 = vunpack.c.0.s8 %v1599_v56 }
 0x5e0   : > { %v1603_v4 = vsub.s32 %v1600_v60, %v2351_v10 }
 0x5f2   : > { %v1093_v9 = vpop.permute.xlu1 %1092 }
 0x5f3   : > { %v1095_v13 = vmul.f32 %v1093_v9, %v1090_v7 }
 0x5f5   : > { %v1098_v14 = vadd.f32 %v1097_v12, %v1095_v13 }
 0x5f7   : > { %v1391_v17 = vrot.slane %v1098_v14, 2  ;;  %v1552_v29 = vrot.slane %v1098_v14, 5 }
 0x5f9   : > { %1392 = vrot.lane.b32.xlu0 %v1391_v17, %s2202_s7 }
 0x64a   : > { %v804_v19 = vpop.permute.xlu0 %803 }
 0x64b   : > { %v806_v23 = vmul.f32 %v804_v19, %v801_v18 }
 0x64d   : > { %v2496_v24 = vadd.f32 %v808_v21, %v806_v23 }
 0x64e   : > { %v1298_v26 = vpop.permute.xlu0 %1297 }
 0x64f   : > { %v1300_v8 = vmul.f32 %v1298_v26, %v1295_v25  ;;  %v1310_v22 = vrot.slane %v2496_v24, 2  ;;  %v1550_v62 = vrot.slane %v2496_v24, 5 }
 0x651   : > { %v1303_v28 = vadd.f32 %v1302_v27, %v1300_v8  ;;  %1311 = vrot.lane.b32.xlu1 %v1310_v22, %s2202_s7 }
 0x653   : > { %v1472_v30 = vrot.slane %v1303_v28, 2  ;;  %v1556_v31 = vrot.slane %v1303_v28, 5 }
 0x655   : > { %1473 = vrot.lane.b32.xlu1 %v1472_v30, %s2202_s7 }
 0x659   : > { %1547 = vrot.lane.b32.xlu1 %v2402_v16, %s2202_s7 }
 0x65d   : > { %1553 = vrot.lane.b32.xlu1 %v1552_v29, %s2204_s9  ;;  %s2205_s9 = smov 98  }
 0x661   : > { %1557 = vrot.lane.b32.xlu1 %v1556_v31, %s2203_s8 }
 0x66b   : > { %v1393_v32 = vpop.permute.xlu0 %1392 }
 0x66c   : > { %1941 = vmatmul.mubr.msk.f32.vlgmr.msra.gmra.mrb[12].mxu0 %vm252_vm2, %v1393_v32 }
 0x6c3   : > { %v1312_v36 = vpop.permute.xlu1 %1311 }
 0x6c4   : > { %1930 = vmatmul.mubr.msk.f32.vlgmr.msra.gmra.mrb[10].mxu1 %vm252_vm2, %v1312_v36 }
 0x6c5   : > { %2034 = vmatpush3.bf16.msra.mxu1 %v2033_v34  ;;  %1951 = vmatprep.mubr.msk.f32.mxu1 %vm2200_vm1, %v2201_v11  ;;  %v1470_v11 = vld [vmem:[#allocation7 + $0x1f8] sm:$0x1] }
 0x6c6   : > { %2035 = vmatprep.subr.bf16.mxu1 %v2199_v5 }
 0x6c7   : > { %v1474_v16 = vpop.permute.xlu1 %1473 }
 0x6c9   : > { %2037 = vmatpush3.bf16.msra.mxu1 %v2036_v37 }
 0x6cb   : > { %v1548_v20 = vpop.permute.xlu1 %1547 }
 0x6cc   : > { %1952 = vmatmul.mubr.msk.f32.vlgmr.msra.gmra.mrb[12].mxu1 %vm252_vm2, %v1474_v16  ;;  %v1580_v1 = vsel %vm252_vm2, %v1548_v20, %v1550_v62 }
 0x6cf   : > { %v1554_v54 = vpop.permute.xlu1 %1553 }
 0x6d0   : > { %v1582_v3 = vsel %vm1581_vm6, %v1580_v1, %v1554_v54 }
 0x6d3   : > { %v1558_v58 = vpop.permute.xlu1 %1557 }
 0x6d4   : > { %v1584_v9 = vsel %vm1583_vm7, %v1582_v3, %v1558_v58 }
 0x73f   : > { %v1462_v39 = vpop.f32.mrb[12].mxu0 }
 0x740   : > { %v1463_v40 = vadd.f32 %v1462_v39, %v1389_v38  ;;  %v1942_v41 = vpop.f32.mrb[13].mxu0 }
 0x742   : > { %v1564_v42 = vrot.slane %v1463_v40, 3 }
 0x744   : > { %1574 = vrot.lane.b32.xlu0 %v1564_v42, %s2205_s9 }
 0x797   : > { %v1381_v44 = vpop.f32.mrb[10].mxu1 }
 0x798   : > { %v1382_v45 = vadd.f32 %v1381_v44, %v1308_v43  ;;  %v1931_v46 = vpop.f32.mrb[11].mxu1 }
 0x79a   : > { %v1561_v47 = vrot.slane %v1382_v45, 3 }
 0x79c   : > { %1571 = vrot.lane.b32.xlu0 %v1561_v47, %s2202_s7 }
 0x79f   : > { %v1543_v5 = vpop.f32.mrb[12].mxu1 }
 0x7a0   : > { %v1544_v49 = vadd.f32 %v1543_v5, %v1470_v11  ;;  %v1953_v50 = vpop.f32.mrb[13].mxu1 }
 0x7a2   : > { %v1569_v51 = vrot.slane %v1544_v49, 3 }
 0x7a4   : > { %1577 = vrot.lane.b32.xlu0 %v1569_v51, %s2206_s10 }
 0x7a8   : > { %1565 = vrot.lane.b32.xlu0 %v1564_v42, %s2203_s8 }
 0x7b6   : > { %v1575_v52 = vpop.permute.xlu0 %1574 }
 0x80e   : > { %v1572_v53 = vpop.permute.xlu0 %1571 }
 0x80f   : > { %v1586_v57 = vsel %vm252_vm2, %v1569_v51, %v1572_v53 }
 0x810   : > { %v1588_v59 = vsel %vm1587_vm3, %v1586_v57, %v1575_v52 }
 0x816   : > { %v1578_v61 = vpop.permute.xlu0 %1577 }
 0x817   : > { %v1590_v63 = vsel %vm1589_vm4, %v1588_v59, %v1578_v61 }
 0x818   : > { %v1592_v0 = vsel %vm1591_vm5, %v1590_v63, 0.0 }
 0x819   : > { %v1597_v6 = vcombine.high %v1592_v0, %v1592_v0 }
 0x81a   : > { %v1566_v7 = vpop.permute.xlu0 %1565 }
 0x81b   : > { %v1585_v12 = vsel %vm1581_vm6, %v1561_v47, %v1566_v7  ;;  %v1611_v14 = vrot.slane %v1597_v6, %v1603_v4 }
 0x81c   : > { %v1596_v13 = vcombine.high %v1584_v9, %v1585_v12 }
 0x81e   : > { %v1604_v17 = vrot.slane %v1596_v13, %v1603_v4 }
 0x820   : > { %v1612_v18 = vcombine.high %v1604_v17, %v1611_v14 }
 0x822   : > { %v1619_v19 = vrot.slane %v1612_v18, %v1603_v4 }
 0x824   : > { %1625 = vst.msk [vmem:[#allocation2] sm:$0x7] %vm1623_vm8, %v1619_v19  ;;  %1626 = vst.msk [vmem:[%s2344_s6] sm:$0x7] %vm1623_vm8, %v1619_v19 }
 0x825 PF: > { %s16_s12 = sadd.s32 1, %s2192_s12  }
 0x826   : > { %p13_p4 = scmp.ge.s32.totalorder %s16_s12, 10  }
 0x828   :  { %15 = sbr.rel (!%p13_p4) target bundleno = 3 (0x3), region = 77 }
 0x82f   :  { %1646 = vsyncpa [#allocation4], 1 }
 0x830   :  { %1648 = vsyncpa [#allocation4 + $0x1], 1 }
 0x831   :  { %1649 = vsyncpa [#allocation8], 1 }
 0x832   :  { %1650 = vsyncpa [#allocation5], 1 }
 0x833   :  { %1652 = vsyncpa [#allocation5 + $0x1], 1 }

</bundles_post_ra>
